<compile_context>
chip_gen: v7x
topology: tpu7x:2x2x1
jax: 0.10.0
libtpu: 0.0.40
codegen_flags: <defaults>
</compile_context>

<pallas_src>
import functools

import jax
import jax.numpy as jnp
from jax.experimental import pallas as pl
from jax.experimental.pallas import tpu as pltpu

LANE = 128
SUBLANE = 8


def _round_up(x, m):
    return (x + m - 1) // m * m


@functools.lru_cache(maxsize=1)
def _default_bf16_eltwise():
    """bf16 VALU elementwise only on v6e/v7x-class chips; f32 on v5e and older."""
    try:
        kind = jax.devices()[0].device_kind.lower()
    except Exception:  # pragma: no cover - defensive
        return True
    return not any(tag in kind for tag in ("v2", "v3", "v4", "v5"))


def _pick_block_b(batch, cap=1024):
    """MXU-width batch tile.

    Large tiles are only chosen when they still leave >=4 grid steps, so v7x's
    two TensorCores each get >=2 steps (keeps the x/out pipeline double
    buffered and avoids a 1-step-per-core grid).  Small batches get a single
    power-of-two tile (bounded set of shapes → bounded recompiles)."""
    for bb in (1024, 512, 256):
        if bb <= cap and batch >= 4 * bb:
            return bb
    if batch > 128:
        return 128
    return max(SUBLANE, int(pl.next_power_of_2(batch)))


def _bucket_num_tiles(n):
    """Bucket the grid length: bounds Mosaic recompiles across ragged batch
    sizes and keeps the tile count even (balanced across v7x's 2 TCs)."""
    if n <= 2:
        return n
    if n <= 4:
        return 4
    if n <= 16:
        return _round_up(n, 2)
    return _round_up(n, 4)


def _encoder_kernel(x_ref,
                    w1_ref, b1_ref,
                    w2_ref, b2_ref,
                    w3_ref, b3_ref,
                    w4_ref, b4_ref,
                    o_ref, *, act_dtype):
    """Fused 4-layer MLP.  All weights resident in VMEM (~1.3 MiB bf16 total).

    Matmul operands are bf16, accumulation f32 (preferred_element_type).
    Hidden bias-add/ReLU happen in `act_dtype` (bf16 on v6e/v7x, f32 on v5e).
    x arrives already in bf16; output is written unpadded in f32."""

    def hidden_layer(h, w_ref, b_ref):
        acc = jnp.dot(h, w_ref[...], preferred_element_type=jnp.float32)
        acc = acc.astype(act_dtype) + b_ref[...].astype(act_dtype)
        return jnp.maximum(acc, 0).astype(jnp.bfloat16)

    h = hidden_layer(x_ref[...], w1_ref, b1_ref)   # param_dim -> 1024
    h = hidden_layer(h, w2_ref, b2_ref)            # 1024      -> 512
    h = hidden_layer(h, w3_ref, b3_ref)            # 512       -> 128
    out = jnp.dot(h, w4_ref[...], preferred_element_type=jnp.float32) + b4_ref[...]
    o_ref[...] = out.astype(o_ref.dtype)           # 128       -> embed_dim


@functools.partial(jax.jit, static_argnames=("block_b", "b_pad", "bf16_eltwise"))
def _encoder_fwd_jit(x, w1, b1, w2, b2, w3, b3, w4, b4,
                     *, block_b, b_pad, bf16_eltwise):
    B, param_dim = x.shape
    if param_dim != w1.shape[0]:
        raise ValueError(
            f"x has {param_dim} features but w1 expects {w1.shape[0]}")
    embed_dim = w4.shape[1]
    act_dtype = jnp.bfloat16 if bf16_eltwise else jnp.float32

    # Ship x as bf16; pad the batch dim only, and only when needed.
    x = x.astype(jnp.bfloat16)
    if b_pad != B:
        x = jnp.pad(x, ((0, b_pad - B), (0, 0)))

    grid = (b_pad // block_b,)

    def invariant(shape):
        # Whole-array block, constant index across the batch grid axis
        # (DMA'd once, stays resident in VMEM for the whole grid).
        nd = len(shape)
        return pl.BlockSpec(shape, lambda i, _nd=nd: (0,) * _nd)

    out = pl.pallas_call(
        functools.partial(_encoder_kernel, act_dtype=act_dtype),
        out_shape=jax.ShapeDtypeStruct((b_pad, embed_dim), jnp.float32),
        grid=grid,
        in_specs=[
            pl.BlockSpec((block_b, param_dim), lambda i: (i, 0)),  # x tile
            invariant(w1.shape), invariant(b1.shape),
            invariant(w2.shape), invariant(b2.shape),
            invariant(w3.shape), invariant(b3.shape),
            invariant(w4.shape), invariant(b4.shape),
        ],
        out_specs=pl.BlockSpec((block_b, embed_dim), lambda i: (i, 0)),
        compiler_params=pltpu.CompilerParams(
            dimension_semantics=("parallel",),
            vmem_limit_bytes=32 * 1024 * 1024,   # covers v5e's 16 MiB default
        ),
    )(x, w1, b1, w2, b2, w3, b3, w4, b4)

    return out if b_pad == B else out[:B]


def encoder_forward(x, prepared_params, block_b=None, bucket_batch=True):
    """x: [B, param_dim] float array.  Returns [B, embed_dim] float32."""
    p = prepared_params
    B = x.shape[0]
    bf16_eltwise = _default_bf16_eltwise()
    if block_b is None:
        block_b = _pick_block_b(B, cap=1024 if bf16_eltwise else 512)
    n_tiles = -(-B // block_b)
    if bucket_batch:
        n_tiles = _bucket_num_tiles(n_tiles)
    b_pad = n_tiles * block_b
    return _encoder_fwd_jit(
        x, p["w1"], p["b1"], p["w2"], p["b2"], p["w3"], p["b3"], p["w4"], p["b4"],
        block_b=block_b, b_pad=b_pad, bf16_eltwise=bf16_eltwise)


def prepare_encoder_params(params, param_dim=None):
    """One-time conversion: bf16 weights (half the DMA, 2x MXU throughput),
    f32 biases shaped (1, out).  No shape padding needed anymore."""
    out = {}
    for li in range(1, 5):
        out[f"w{li}"] = jnp.asarray(params[f"w{li}"], jnp.bfloat16)
        out[f"b{li}"] = jnp.asarray(params[f"b{li}"], jnp.float32).reshape(1, -1)
    return out


def init_encoder_params(key, param_dim, embed_dim=8):
    """Init mirroring PyTorch nn.Linear default (uniform +/- 1/sqrt(fan_in)).
    Weights stored transposed vs PyTorch: shape (in_features, out_features)."""
    dims = [param_dim, 1024, 512, 128, embed_dim]
    params = {}
    for li in range(4):
        fan_in, fan_out = dims[li], dims[li + 1]
        key, kw, kb = jax.random.split(key, 3)
        bound = 1.0 / jnp.sqrt(jnp.asarray(fan_in, jnp.float32))
        params[f"w{li+1}"] = jax.random.uniform(
            kw, (fan_in, fan_out), jnp.float32, -bound, bound)
        params[f"b{li+1}"] = jax.random.uniform(
            kb, (1, fan_out), jnp.float32, -bound, bound)
    return params


def encoder_reference_f32(x, params):
    h = x
    for li in range(1, 4):
        h = jnp.maximum(h @ params[f"w{li}"] + params[f"b{li}"], 0.0)
    return h @ params["w4"] + params["b4"]


def encoder_reference_kernel_numerics(x, params, bf16_eltwise):
    """Mirrors the kernel's numerics: bf16 matmul operands, f32 accumulation,
    bias-add/ReLU in act_dtype."""
    act = jnp.bfloat16 if bf16_eltwise else jnp.float32
    h = x.astype(jnp.bfloat16)
    for li in range(1, 4):
        acc = jnp.dot(h, params[f"w{li}"].astype(jnp.bfloat16),
                      preferred_element_type=jnp.float32)
        acc = acc.astype(act) + params[f"b{li}"].astype(act)
        h = jnp.maximum(acc, 0).astype(jnp.bfloat16)
    return jnp.dot(h, params["w4"].astype(jnp.bfloat16),
                   preferred_element_type=jnp.float32) + params["b4"]


if __name__ == "__main__":
    key = jax.random.PRNGKey(0)
    param_dim = 64
    embed_dim = 8

    k_params, k_x1, k_x2 = jax.random.split(key, 3)
    params = init_encoder_params(k_params, param_dim, embed_dim)
    prepared = prepare_encoder_params(params)
    bf16_elt = _default_bf16_eltwise()

    # Small batch: single tile, no padding, no slice.
    batch = 8
    x = jax.random.normal(k_x1, (batch, param_dim), jnp.float32)
    out = jax.block_until_ready(encoder_forward(x, prepared))
    assert out.shape == (batch, embed_dim), out.shape
    assert out.dtype == jnp.float32, out.dtype
    ref_k = encoder_reference_kernel_numerics(x, params, bf16_elt)
    ref_f32 = encoder_reference_f32(x, params)
    assert jnp.allclose(out, ref_k, atol=2e-3, rtol=2e-3), \
        float(jnp.max(jnp.abs(out - ref_k)))
    assert jnp.allclose(out, ref_f32, atol=2e-2, rtol=2e-2), \
        float(jnp.max(jnp.abs(out - ref_f32)))

    # Ragged batch: exercises multi-step grid, tile-count bucketing (3 -> 4
    # tiles of 128), batch padding and the output row-slice.
    batch2 = 260
    x2 = jax.random.normal(k_x2, (batch2, param_dim), jnp.float32)
    out2 = jax.block_until_ready(encoder_forward(x2, prepared))
    assert out2.shape == (batch2, embed_dim), out2.shape
    ref2 = encoder_reference_kernel_numerics(x2, params, bf16_elt)
    assert jnp.allclose(out2, ref2, atol=2e-3, rtol=2e-3), \
        float(jnp.max(jnp.abs(out2 - ref2)))

    print("KERNEL_OK")
</pallas_src>

<mosaic_0001>
module attributes {stable_mosaic.version = 11 : i64} {
  func.func @_encoder_kernel(%arg0: i32, %arg1: memref<8x64xbf16, #tpu.memory_space<vmem>>, %arg2: memref<64x1024xbf16, #tpu.memory_space<vmem>>, %arg3: memref<1x1024xf32, #tpu.memory_space<vmem>>, %arg4: memref<1024x512xbf16, #tpu.memory_space<vmem>>, %arg5: memref<1x512xf32, #tpu.memory_space<vmem>>, %arg6: memref<512x128xbf16, #tpu.memory_space<vmem>>, %arg7: memref<1x128xf32, #tpu.memory_space<vmem>>, %arg8: memref<128x8xbf16, #tpu.memory_space<vmem>>, %arg9: memref<1x8xf32, #tpu.memory_space<vmem>>, %arg10: memref<8x8xf32, #tpu.memory_space<vmem>>) attributes {dimension_semantics = [#tpu.dimension_semantics<parallel>], iteration_bounds = array<i64: 1>, scalar_prefetch = 0 : i64, scratch_operands = 0 : i64, tpu.core_type = #tpu.core_type<tc>, window_params = [{transform_indices = @transform_0, window_bounds = array<i64: 8, 64>}, {pipeline_mode = #tpu.pipeline_mode<synchronous>, transform_indices = @transform_1, window_bounds = array<i64: 64, 1024>}, {pipeline_mode = #tpu.pipeline_mode<synchronous>, transform_indices = @transform_2, window_bounds = array<i64: 1, 1024>}, {pipeline_mode = #tpu.pipeline_mode<synchronous>, transform_indices = @transform_3, window_bounds = array<i64: 1024, 512>}, {pipeline_mode = #tpu.pipeline_mode<synchronous>, transform_indices = @transform_4, window_bounds = array<i64: 1, 512>}, {pipeline_mode = #tpu.pipeline_mode<synchronous>, transform_indices = @transform_5, window_bounds = array<i64: 512, 128>}, {pipeline_mode = #tpu.pipeline_mode<synchronous>, transform_indices = @transform_6, window_bounds = array<i64: 1, 128>}, {pipeline_mode = #tpu.pipeline_mode<synchronous>, transform_indices = @transform_7, window_bounds = array<i64: 128, 8>}, {pipeline_mode = #tpu.pipeline_mode<synchronous>, transform_indices = @transform_8, window_bounds = array<i64: 1, 8>}, {transform_indices = @transform_9, window_bounds = array<i64: 8, 8>}]} {
    %c0 = arith.constant 0 : index
    %c0_0 = arith.constant 0 : index
    %0 = vector.load %arg1[%c0, %c0_0] : memref<8x64xbf16, #tpu.memory_space<vmem>>, vector<8x64xbf16>
    %c0_1 = arith.constant 0 : index
    %c0_2 = arith.constant 0 : index
    %1 = vector.load %arg2[%c0_1, %c0_2] : memref<64x1024xbf16, #tpu.memory_space<vmem>>, vector<64x1024xbf16>
    %cst = arith.constant dense<0.000000e+00> : vector<8x1024xf32>
    %2 = tpu.matmul %0, %1, %cst {dimension_numbers = #tpu.dot_dimension_numbers<[1], [0], [0], [1], [0, 0, 1, 1], [], []>} : vector<8x64xbf16>, vector<64x1024xbf16>, vector<8x1024xf32> -> vector<8x1024xf32>
    %3 = arith.truncf %2 : vector<8x1024xf32> to vector<8x1024xbf16>
    %c0_3 = arith.constant 0 : index
    %c0_4 = arith.constant 0 : index
    %4 = vector.load %arg3[%c0_3, %c0_4] : memref<1x1024xf32, #tpu.memory_space<vmem>>, vector<1x1024xf32>
    %5 = arith.truncf %4 : vector<1x1024xf32> to vector<1x1024xbf16>
    %6 = vector.broadcast %5 : vector<1x1024xbf16> to vector<8x1024xbf16>
    %7 = arith.addf %3, %6 : vector<8x1024xbf16>
    %cst_5 = arith.constant 0.000000e+00 : bf16
    %8 = vector.broadcast %cst_5 : bf16 to vector<8x1024xbf16>
    %9 = arith.maximumf %7, %8 : vector<8x1024xbf16>
    %c0_6 = arith.constant 0 : index
    %c0_7 = arith.constant 0 : index
    %10 = vector.load %arg4[%c0_6, %c0_7] : memref<1024x512xbf16, #tpu.memory_space<vmem>>, vector<1024x512xbf16>
    %cst_8 = arith.constant dense<0.000000e+00> : vector<8x512xf32>
    %11 = tpu.matmul %9, %10, %cst_8 {dimension_numbers = #tpu.dot_dimension_numbers<[1], [0], [0], [1], [0, 0, 1, 1], [], []>} : vector<8x1024xbf16>, vector<1024x512xbf16>, vector<8x512xf32> -> vector<8x512xf32>
    %12 = arith.truncf %11 : vector<8x512xf32> to vector<8x512xbf16>
    %c0_9 = arith.constant 0 : index
    %c0_10 = arith.constant 0 : index
    %13 = vector.load %arg5[%c0_9, %c0_10] : memref<1x512xf32, #tpu.memory_space<vmem>>, vector<1x512xf32>
    %14 = arith.truncf %13 : vector<1x512xf32> to vector<1x512xbf16>
    %15 = vector.broadcast %14 : vector<1x512xbf16> to vector<8x512xbf16>
    %16 = arith.addf %12, %15 : vector<8x512xbf16>
    %cst_11 = arith.constant 0.000000e+00 : bf16
    %17 = vector.broadcast %cst_11 : bf16 to vector<8x512xbf16>
    %18 = arith.maximumf %16, %17 : vector<8x512xbf16>
    %c0_12 = arith.constant 0 : index
    %c0_13 = arith.constant 0 : index
    %19 = vector.load %arg6[%c0_12, %c0_13] : memref<512x128xbf16, #tpu.memory_space<vmem>>, vector<512x128xbf16>
    %cst_14 = arith.constant dense<0.000000e+00> : vector<8x128xf32>
    %20 = tpu.matmul %18, %19, %cst_14 {dimension_numbers = #tpu.dot_dimension_numbers<[1], [0], [0], [1], [0, 0, 1, 1], [], []>} : vector<8x512xbf16>, vector<512x128xbf16>, vector<8x128xf32> -> vector<8x128xf32>
    %21 = arith.truncf %20 : vector<8x128xf32> to vector<8x128xbf16>
    %c0_15 = arith.constant 0 : index
    %c0_16 = arith.constant 0 : index
    %22 = vector.load %arg7[%c0_15, %c0_16] : memref<1x128xf32, #tpu.memory_space<vmem>>, vector<1x128xf32>
    %23 = arith.truncf %22 : vector<1x128xf32> to vector<1x128xbf16>
    %24 = vector.broadcast %23 : vector<1x128xbf16> to vector<8x128xbf16>
    %25 = arith.addf %21, %24 : vector<8x128xbf16>
    %cst_17 = arith.constant 0.000000e+00 : bf16
    %26 = vector.broadcast %cst_17 : bf16 to vector<8x128xbf16>
    %27 = arith.maximumf %25, %26 : vector<8x128xbf16>
    %c0_18 = arith.constant 0 : index
    %c0_19 = arith.constant 0 : index
    %28 = vector.load %arg8[%c0_18, %c0_19] : memref<128x8xbf16, #tpu.memory_space<vmem>>, vector<128x8xbf16>
    %cst_20 = arith.constant dense<0.000000e+00> : vector<8x8xf32>
    %29 = tpu.matmul %27, %28, %cst_20 {dimension_numbers = #tpu.dot_dimension_numbers<[1], [0], [0], [1], [0, 0, 1, 1], [], []>} : vector<8x128xbf16>, vector<128x8xbf16>, vector<8x8xf32> -> vector<8x8xf32>
    %c0_21 = arith.constant 0 : index
    %c0_22 = arith.constant 0 : index
    %30 = vector.load %arg9[%c0_21, %c0_22] : memref<1x8xf32, #tpu.memory_space<vmem>>, vector<1x8xf32>
    %31 = vector.broadcast %30 : vector<1x8xf32> to vector<8x8xf32>
    %32 = arith.addf %29, %31 : vector<8x8xf32>
    %c0_23 = arith.constant 0 : index
    %c0_24 = arith.constant 0 : index
    %33 = vector.load %arg10[%c0_23, %c0_24] : memref<8x8xf32, #tpu.memory_space<vmem>>, vector<8x8xf32>
    tpu.vector_store %arg10[%c0_23, %c0_24], %32 {strides = array<i32>} : memref<8x8xf32, #tpu.memory_space<vmem>>, vector<8x8xf32>,
    return
  }
  func.func @transform_0(%arg0: i32) -> (i32, i32) {
    %c0_i32 = arith.constant 0 : i32
    %c0_i32_0 = arith.constant 0 : i32
    return %arg0, %c0_i32 : i32, i32
  }
  func.func @transform_1(%arg0: i32) -> (i32, i32) {
    %c0_i32 = arith.constant 0 : i32
    %c0_i32_0 = arith.constant 0 : i32
    %c0_i32_1 = arith.constant 0 : i32
    return %c0_i32, %c0_i32_0 : i32, i32
  }
  func.func @transform_2(%arg0: i32) -> (i32, i32) {
    %c0_i32 = arith.constant 0 : i32
    %c0_i32_0 = arith.constant 0 : i32
    %c0_i32_1 = arith.constant 0 : i32
    return %c0_i32, %c0_i32_0 : i32, i32
  }
  func.func @transform_3(%arg0: i32) -> (i32, i32) {
    %c0_i32 = arith.constant 0 : i32
    %c0_i32_0 = arith.constant 0 : i32
    %c0_i32_1 = arith.constant 0 : i32
    return %c0_i32, %c0_i32_0 : i32, i32
  }
  func.func @transform_4(%arg0: i32) -> (i32, i32) {
    %c0_i32 = arith.constant 0 : i32
    %c0_i32_0 = arith.constant 0 : i32
    %c0_i32_1 = arith.constant 0 : i32
    return %c0_i32, %c0_i32_0 : i32, i32
  }
  func.func @transform_5(%arg0: i32) -> (i32, i32) {
    %c0_i32 = arith.constant 0 : i32
    %c0_i32_0 = arith.constant 0 : i32
    %c0_i32_1 = arith.constant 0 : i32
    return %c0_i32, %c0_i32_0 : i32, i32
  }
  func.func @transform_6(%arg0: i32) -> (i32, i32) {
    %c0_i32 = arith.constant 0 : i32
    %c0_i32_0 = arith.constant 0 : i32
    %c0_i32_1 = arith.constant 0 : i32
    return %c0_i32, %c0_i32_0 : i32, i32
  }
  func.func @transform_7(%arg0: i32) -> (i32, i32) {
    %c0_i32 = arith.constant 0 : i32
    %c0_i32_0 = arith.constant 0 : i32
    %c0_i32_1 = arith.constant 0 : i32
    return %c0_i32, %c0_i32_0 : i32, i32
  }
  func.func @transform_8(%arg0: i32) -> (i32, i32) {
    %c0_i32 = arith.constant 0 : i32
    %c0_i32_0 = arith.constant 0 : i32
    %c0_i32_1 = arith.constant 0 : i32
    return %c0_i32, %c0_i32_0 : i32, i32
  }
  func.func @transform_9(%arg0: i32) -> (i32, i32) {
    %c0_i32 = arith.constant 0 : i32
    %c0_i32_0 = arith.constant 0 : i32
    return %arg0, %c0_i32 : i32, i32
  }
}

</mosaic_0001>

<bundles_post_ra>
// kernel: _encoder_fwd_jit.1
= control target key start
LH: loop header
LB: loop body
LE: loop exit
PB: predicated region body
PF: predicated region fallthrough
CT: control target
= control target key end

     0   :  { %14 = vsyncpa [#allocation3], 0  ;;  %s4189_s0 = inlined_call_operand.vmem [shape: bf16[8,64], index: 0, kind: input, shape index: {}]   ;;  %s4190_s1 = inlined_call_operand.hbm [shape: bf16[64,1024], index: 1, kind: input, shape index: {}]   ;;  %s4191_s2 = inlined_call_operand.vmem [shape: f32[1,1024], index: 2, kind: input, shape index: {}]   ;;  %s4192_s3 = inlined_call_operand.hbm [shape: bf16[1024,512], index: 3, kind: input, shape index: {}]   ;;  %s4193_s4 = inlined_call_operand.vmem [shape: f32[1,512], index: 4, kind: input, shape index: {}]   ;;  %s4194_s5 = inlined_call_operand.hbm [shape: bf16[512,128], index: 5, kind: input, shape index: {}]   ;;  %s4195_s6 = inlined_call_operand.vmem [shape: f32[1,128], index: 6, kind: input, shape index: {}]   ;;  %s4196_s7 = inlined_call_operand.vmem [shape: bf16[128,8], index: 7, kind: input, shape index: {}]   ;;  %s4197_s8 = inlined_call_operand.vmem [shape: f32[1,8], index: 8, kind: input, shape index: {}]   ;;  %s4198_s9 = inlined_call_operand.hbm [shape: f32[8,8], index: 9, kind: output, shape index: {}]  }
   0x1   :  { %15 = vsyncpa [#allocation6], 0 }
   0x2   :  { %16 = vsyncpa [#allocation4], 0  ;;  %s3934_s30 = smov [#allocation5]   ;;  %s3840_s13 = scalar_lea.hbm %s4192_s3, 32768 }
   0x3   :  { %s38_s10 = sshll.u32 %s3934_s30, 4  ;;  %p3841_p0 = scmp.ne.s32.totalorder %s4192_s3, %s3840_s13  ;;  %s39_s10 = int_to_ptr.vmem [resolvable:$true] %s38_s10 }
   0x4   :  { %p3844_p1 = scmp.lt.u32.totalorder %s3840_s13, %s4192_s3 }
   0x6   :  { %p3846_p2 = pnand %p3844_p1, %p3841_p0 }
   0x8   :  { %3849 = shalt.err (!%p3846_p2)
}
   0x9   :  { %s3850_s18 = scalar_lea.vmem %s39_s10, 32768  ;;  %p3855_p4 = scmp.lt.s32.totalorder %s39_s10, %s39_s10 }
   0xa   :  { %p3851_p3 = scmp.ne.s32.totalorder %s39_s10, %s3850_s18  ;;  %p3856_p5 = scmp.lt.s32.totalorder %s3850_s18, %s3850_s18 }
   0xc   :  { %p3857_p6 = por %p3856_p5, %p3855_p4 }
   0xe   :  { %p3858_p7 = pnand %p3857_p6, %p3851_p3 }
  0x10   :  { %3861 = shalt.err (!%p3858_p7)
}
  0x11   :  { %s3935_s19 = smov 256   ;;  %s3936_s20 = smov 16  }
  0x12   :  { %44 = dma.hbm_to_vmem [thread:$0]  %s4192_s3, 32768, %s39_s10, [#allocation6], %s3935_s19, %s3935_s19, %s3936_s20  }
  0x13   :  { %s3937_s23 = smov [#allocation2]   ;;  %s3862_s27 = scalar_lea.hbm %s4190_s1, 4096 }
  0x14   :  { %s24_s24 = sshll.u32 %s3937_s23, 4  ;;  %p3863_p8 = scmp.ne.s32.totalorder %s4190_s1, %s3862_s27  ;;  %s25_s24 = int_to_ptr.vmem [resolvable:$true] %s24_s24 }
  0x15   :  { %p3866_p9 = scmp.lt.u32.totalorder %s3862_s27, %s4190_s1 }
  0x17   :  { %p3868_p10 = pnand %p3866_p9, %p3863_p8 }
  0x19   :  { %3871 = shalt.err (!%p3868_p10)
}
  0x1a   :  { %s3872_s12 = scalar_lea.vmem %s25_s24, 4096  ;;  %p3877_p12 = scmp.lt.s32.totalorder %s25_s24, %s25_s24 }
  0x1b   :  { %p3873_p11 = scmp.ne.s32.totalorder %s25_s24, %s3872_s12  ;;  %p3878_p13 = scmp.lt.s32.totalorder %s3872_s12, %s3872_s12 }
  0x1d   :  { %p3879_p0 = por %p3878_p13, %p3877_p12 }
  0x1f   :  { %p3880_p1 = pnand %p3879_p0, %p3873_p11 }
  0x21   :  { %3883 = shalt.err (!%p3880_p1)
}
  0x22   :  { %s3938_s3 = smov 512   ;;  %s3939_s10 = smov 32  }
  0x23   :  { %30 = dma.hbm_to_vmem [thread:$0]  %s4190_s1, 4096, %s25_s24, [#allocation3], %s3938_s3, %s3938_s3, %s3939_s10  }
  0x24   :  { %s3940_s15 = smov [#allocation7]   ;;  %s3884_s19 = scalar_lea.hbm %s4194_s5, 4096 }
  0x25   :  { %s52_s16 = sshll.u32 %s3940_s15, 4  ;;  %p3885_p2 = scmp.ne.s32.totalorder %s4194_s5, %s3884_s19  ;;  %s53_s16 = int_to_ptr.vmem [resolvable:$true] %s52_s16 }
  0x26   :  { %p3888_p3 = scmp.lt.u32.totalorder %s3884_s19, %s4194_s5 }
  0x28   :  { %p3890_p4 = pnand %p3888_p3, %p3885_p2 }
  0x2a   :  { %3893 = shalt.err (!%p3890_p4)
}
  0x2b   :  { %s3894_s25 = scalar_lea.vmem %s53_s16, 4096  ;;  %p3899_p6 = scmp.lt.s32.totalorder %s53_s16, %s53_s16 }
  0x2c   :  { %p3895_p5 = scmp.ne.s32.totalorder %s53_s16, %s3894_s25  ;;  %p3900_p7 = scmp.lt.s32.totalorder %s3894_s25, %s3894_s25 }
  0x2e   :  { %p3901_p8 = por %p3900_p7, %p3899_p6 }
  0x30   :  { %p3902_p9 = pnand %p3901_p8, %p3895_p5 }
  0x32   :  { %3905 = shalt.err (!%p3902_p9)
}
  0x33   :  { %s3941_s1 = smov 64   ;;  %s3942_s24 = smov 4  }
  0x34   :  { %58 = dma.hbm_to_vmem [thread:$0]  %s4194_s5, 4096, %s53_s16, [#allocation6], %s3941_s1, %s3941_s1, %s3942_s24  }
  0x35   :  { %3928 = dma.done.wait [#allocation3], 4096  }
  0x36   :  { %3929 = vsyncadd [#allocation3], 4294963200 }
  0x37   :  { %3930 = dma.done.wait [#allocation6], 36864  }
  0x38   :  { %3931 = vsyncadd [#allocation6], 4294930432  ;;  %v3943_v0 = vmov 0   ;;  %v76_v1 = vld [vmem:[#allocation2] sm:$0xff]  ;;  %v78_v14 = vld [vmem:[#allocation2 + $0x10] sm:$0xff]  ;;  %vm268_vm0 = vcmask 523264  }
  0x39   :  { %304 = vmatprep.mubr.bf16.mxu1 %v3943_v0  ;;  %386 = vmatprep.mubr.bf16.mxu0 %v3943_v0  ;;  %v80_v2 = vld [vmem:[#allocation2 + $0x20] sm:$0xff]  ;;  %v82_v15 = vld [vmem:[#allocation2 + $0x30] sm:$0xff]  ;;  %v77_v25 = vld [vmem:[#allocation2 + $0x8] sm:$0xff]  ;;  %vm3945_vm1 = vmmov 0   ;;  %s3946_s24 = smov [#allocation8]   ;;  %vm2955_vm2 = vcmask 64512  }
  0x3a   :  { %v84_v3 = vld [vmem:[#allocation2 + $0x40] sm:$0xff]  ;;  %v2974_v4 = vcombine.high %v76_v1, %v80_v2  ;;  %v2973_v5 = vcombine.low %v76_v1, %v80_v2  ;;  %v86_v16 = vld [vmem:[#allocation2 + $0x50] sm:$0xff]  ;;  %v2978_v18 = vcombine.high %v78_v14, %v82_v15  ;;  %v2977_v19 = vcombine.low %v78_v14, %v82_v15  ;;  %v81_v26 = vld [vmem:[#allocation2 + $0x28] sm:$0xff]  ;;  %s2963_s26 = sshll.u32 %s3946_s24, 4  ;;  %s2964_s26 = int_to_ptr.vmem [resolvable:$true] %s2963_s26 }
  0x3b   :  { %v88_v6 = vld [vmem:[#allocation2 + $0x60] sm:$0xff]  ;;  %v90_v17 = vld [vmem:[#allocation2 + $0x70] sm:$0xff]  ;;  %v2976_v32 = vcombine.high %v77_v25, %v81_v26  ;;  %v85_v33 = vld [vmem:[#allocation2 + $0x48] sm:$0xff]  ;;  %v2975_v38 = vcombine.low %v77_v25, %v81_v26  ;;  %s3906_s27 = scalar_lea.vmem %s2964_s26, 128  ;;  %p3911_p11 = scmp.lt.s32.totalorder %s2964_s26, %s2964_s26 }
  0x3c   :  { %v2982_v7 = vcombine.high %v84_v3, %v88_v6  ;;  %v92_v8 = vld [vmem:[#allocation2 + $0x80] sm:$0xff]  ;;  %272 = vmatprep.subr.bf16.mxu1 %v2974_v4  ;;  %v2981_v10 = vcombine.low %v84_v3, %v88_v6  ;;  %v2986_v20 = vcombine.high %v86_v16, %v90_v17  ;;  %v94_v22 = vld [vmem:[#allocation2 + $0x90] sm:$0xff]  ;;  %354 = vmatprep.subr.bf16.mxu0 %v2978_v18  ;;  %v89_v34 = vld [vmem:[#allocation2 + $0x68] sm:$0xff]  ;;  %p3907_p10 = scmp.ne.s32.totalorder %s2964_s26, %s3906_s27  ;;  %p3912_p12 = scmp.lt.s32.totalorder %s3906_s27, %s3906_s27 }
  0x3d   :  { %v96_v9 = vld [vmem:[#allocation2 + $0xa0] sm:$0xff]  ;;  %273 = vmatpush1.bf16.msra.mxu1 %v2973_v5  ;;  %v98_v23 = vld [vmem:[#allocation2 + $0xb0] sm:$0xff]  ;;  %355 = vmatpush1.bf16.msra.mxu0 %v2977_v19  ;;  %v2985_v27 = vcombine.low %v86_v16, %v90_v17  ;;  %v2984_v39 = vcombine.high %v85_v33, %v89_v34  ;;  %v93_v40 = vld [vmem:[#allocation2 + $0x88] sm:$0xff]  ;;  %v2983_v44 = vcombine.low %v85_v33, %v89_v34 }
  0x3e   :  { %274 = vmatprep.subr.bf16.mxu1 %v2982_v7  ;;  %v2990_v11 = vcombine.high %v92_v8, %v96_v9  ;;  %v100_v12 = vld [vmem:[#allocation2 + $0xc0] sm:$0xff]  ;;  %v2989_v21 = vcombine.low %v92_v8, %v96_v9  ;;  %356 = vmatprep.subr.bf16.mxu0 %v2986_v20  ;;  %v2994_v28 = vcombine.high %v94_v22, %v98_v23  ;;  %v102_v29 = vld [vmem:[#allocation2 + $0xd0] sm:$0xff]  ;;  %v97_v41 = vld [vmem:[#allocation2 + $0xa8] sm:$0xff]  ;;  %p3913_p13 = por %p3912_p12, %p3911_p11 }
  0x3f   :  { %v104_v13 = vld [vmem:[#allocation2 + $0xe0] sm:$0xff]  ;;  %v106_v31 = vld [vmem:[#allocation2 + $0xf0] sm:$0xff]  ;;  %v2993_v35 = vcombine.low %v94_v22, %v98_v23  ;;  %v2992_v45 = vcombine.high %v93_v40, %v97_v41  ;;  %v101_v46 = vld [vmem:[#allocation2 + $0xc8] sm:$0xff]  ;;  %v2991_v50 = vcombine.low %v93_v40, %v97_v41 }
  0x40   :  { %v2998_v24 = vcombine.high %v100_v12, %v104_v13  ;;  %v2997_v30 = vcombine.low %v100_v12, %v104_v13  ;;  %v3002_v36 = vcombine.high %v102_v29, %v106_v31  ;;  %v4038_v37 = vld [vmem:[%s4189_s0] sm:$0xf]  ;;  %v3001_v42 = vcombine.low %v102_v29, %v106_v31  ;;  %v3418_v43 = vld [vmem:[#allocation5 + $0x4] ss:$16 sps:$4 sm:$0xff]   ;;  %v105_v47 = vld [vmem:[#allocation2 + $0xe8] sm:$0xff]  ;;  %p3914_p0 = pnand %p3913_p13, %p3907_p10 }
  0x41   :  { %275 = vmatpush1.bf16.msra.mxu1 %v2981_v10  ;;  %357 = vmatpush1.bf16.msra.mxu0 %v2985_v27  ;;  %v3416_v48 = vld [vmem:[#allocation5] ss:$16 sps:$4 sm:$0xff]   ;;  %v3424_v49 = vld [vmem:[#allocation5 + $0x24] ss:$16 sps:$4 sm:$0xff]   ;;  %v3000_v51 = vcombine.high %v101_v46, %v105_v47  ;;  %v79_v52 = vld [vmem:[#allocation2 + $0x18] sm:$0xff]  ;;  %v2999_v56 = vcombine.low %v101_v46, %v105_v47 }
  0x42   :  { %276 = vmatprep.subr.bf16.mxu1 %v2990_v11  ;;  %358 = vmatprep.subr.bf16.mxu0 %v2994_v28  ;;  %v83_v53 = vld [vmem:[#allocation2 + $0x38] sm:$0xff]  ;;  %v3422_v54 = vld [vmem:[#allocation5 + $0x20] ss:$16 sps:$4 sm:$0xff]   ;;  %v3430_v55 = vld [vmem:[#allocation5 + $0x44] ss:$16 sps:$4 sm:$0xff]  }
  0x43   :  { %v2980_v57 = vcombine.high %v79_v52, %v83_v53  ;;  %v87_v58 = vld [vmem:[#allocation2 + $0x58] sm:$0xff]  ;;  %v3428_v60 = vld [vmem:[#allocation5 + $0x40] ss:$16 sps:$4 sm:$0xff]   ;;  %v3436_v61 = vld [vmem:[#allocation5 + $0x64] ss:$16 sps:$4 sm:$0xff]   ;;  %v2979_v62 = vcombine.low %v79_v52, %v83_v53 }
  0x44   :  { %v91_v59 = vld [vmem:[#allocation2 + $0x78] sm:$0xff]  ;;  %v3434_v3 = vld [vmem:[#allocation5 + $0x60] ss:$16 sps:$4 sm:$0xff]   ;;  %v3442_v4 = vld [vmem:[#allocation5 + $0x84] ss:$16 sps:$4 sm:$0xff]  }
  0x45   :  { %277 = vmatpush1.bf16.msra.mxu1 %v2989_v21  ;;  %359 = vmatpush1.bf16.msra.mxu0 %v2993_v35  ;;  %v2988_v63 = vcombine.high %v87_v58, %v91_v59  ;;  %v95_v1 = vld [vmem:[#allocation2 + $0x98] sm:$0xff]  ;;  %v2987_v5 = vcombine.low %v87_v58, %v91_v59  ;;  %v3440_v9 = vld [vmem:[#allocation5 + $0x80] ss:$16 sps:$4 sm:$0xff]   ;;  %v3448_v10 = vld [vmem:[#allocation5 + $0xa4] ss:$16 sps:$4 sm:$0xff]  }
  0x46   :  { %278 = vmatprep.subr.bf16.mxu1 %v2998_v24  ;;  %360 = vmatprep.subr.bf16.mxu0 %v3002_v36  ;;  %v99_v2 = vld [vmem:[#allocation2 + $0xb8] sm:$0xff]  ;;  %v3446_v13 = vld [vmem:[#allocation5 + $0xa0] ss:$16 sps:$4 sm:$0xff]   ;;  %v3454_v14 = vld [vmem:[#allocation5 + $0xc4] ss:$16 sps:$4 sm:$0xff]  }
  0x47   :  { %v2996_v6 = vcombine.high %v95_v1, %v99_v2  ;;  %v103_v7 = vld [vmem:[#allocation2 + $0xd8] sm:$0xff]  ;;  %v2995_v11 = vcombine.low %v95_v1, %v99_v2  ;;  %v3452_v18 = vld [vmem:[#allocation5 + $0xc0] ss:$16 sps:$4 sm:$0xff]   ;;  %v3460_v20 = vld [vmem:[#allocation5 + $0xe4] ss:$16 sps:$4 sm:$0xff]  }
  0x48   :  { %v107_v8 = vld [vmem:[#allocation2 + $0xf8] sm:$0xff]  ;;  %v3458_v21 = vld [vmem:[#allocation5 + $0xe0] ss:$16 sps:$4 sm:$0xff]   ;;  %v3466_v22 = vld [vmem:[#allocation5 + $0x104] ss:$16 sps:$4 sm:$0xff]  }
  0x49   :  { %279 = vmatpush1.bf16.msra.mxu1 %v2997_v30  ;;  %361 = vmatpush1.bf16.msra.mxu0 %v3001_v42  ;;  %v3004_v12 = vcombine.high %v103_v7, %v107_v8  ;;  %v3003_v15 = vcombine.low %v103_v7, %v107_v8  ;;  %v3421_v16 = vld [vmem:[#allocation5 + $0xc] ss:$16 sps:$4 sm:$0xff]   ;;  %v3419_v17 = vld [vmem:[#allocation5 + $0x8] ss:$16 sps:$4 sm:$0xff]   ;;  %v3464_v25 = vld [vmem:[#allocation5 + $0x100] ss:$16 sps:$4 sm:$0xff]  }
  0x4a   :  { %313 = vmatprep.subr.bf16.mxu1 %v2976_v32  ;;  %2102 = vmatprep.subr.bf16.mxu0 %v3418_v43  ;;  %v3427_v19 = vld [vmem:[#allocation5 + $0x2c] ss:$16 sps:$4 sm:$0xff]   ;;  %v3425_v23 = vld [vmem:[#allocation5 + $0x28] ss:$16 sps:$4 sm:$0xff]   ;;  %v3472_v26 = vld [vmem:[#allocation5 + $0x124] ss:$16 sps:$4 sm:$0xff]  }
  0x4b   :  { %v3433_v24 = vld [vmem:[#allocation5 + $0x4c] ss:$16 sps:$4 sm:$0xff]   ;;  %v3431_v27 = vld [vmem:[#allocation5 + $0x48] ss:$16 sps:$4 sm:$0xff]   ;;  %v3470_v29 = vld [vmem:[#allocation5 + $0x120] ss:$16 sps:$4 sm:$0xff]  }
  0x4c   :  { %3005 = vmatmul.mubr.msk.bf16.vlgmr.msra.gmra.mrb[0].mxu1 %vm268_vm0, %v4038_v37  ;;  %3007 = vmatmul.mubr.msk.bf16.vlgmr.msra.gmra.mrb[0].mxu0 %vm268_vm0, %v4038_v37  ;;  %v3439_v28 = vld [vmem:[#allocation5 + $0x6c] ss:$16 sps:$4 sm:$0xff]   ;;  %v3478_v30 = vld [vmem:[#allocation5 + $0x144] ss:$16 sps:$4 sm:$0xff]   ;;  %v3437_v31 = vld [vmem:[#allocation5 + $0x68] ss:$16 sps:$4 sm:$0xff]  }
  0x4d   :  { %314 = vmatpush1.bf16.msra.mxu1 %v2975_v38  ;;  %345 = vmatprep.mubr.bf16.mxu1 %v3943_v0  ;;  %v3445_v32 = vld [vmem:[#allocation5 + $0x8c] ss:$16 sps:$4 sm:$0xff]   ;;  %v3476_v33 = vld [vmem:[#allocation5 + $0x140] ss:$16 sps:$4 sm:$0xff]   ;;  %v3484_v34 = vld [vmem:[#allocation5 + $0x164] ss:$16 sps:$4 sm:$0xff]  }
  0x4e   :  { %315 = vmatprep.subr.bf16.mxu1 %v2984_v39  ;;  %2103 = vmatpush1.bf16.msra.mxu0 %v3416_v48  ;;  %v3443_v35 = vld [vmem:[#allocation5 + $0x88] ss:$16 sps:$4 sm:$0xff]   ;;  %v3451_v36 = vld [vmem:[#allocation5 + $0xac] ss:$16 sps:$4 sm:$0xff]   ;;  %v3490_v38 = vld [vmem:[#allocation5 + $0x184] ss:$16 sps:$4 sm:$0xff]  }
  0x4f   :  { %2104 = vmatprep.subr.bf16.mxu0 %v3424_v49  ;;  %v3449_v39 = vld [vmem:[#allocation5 + $0xa8] ss:$16 sps:$4 sm:$0xff]   ;;  %v3457_v40 = vld [vmem:[#allocation5 + $0xcc] ss:$16 sps:$4 sm:$0xff]   ;;  %v3488_v41 = vld [vmem:[#allocation5 + $0x180] ss:$16 sps:$4 sm:$0xff]  }
  0x50   :  { %v3496_v42 = vld [vmem:[#allocation5 + $0x1a4] ss:$16 sps:$4 sm:$0xff]   ;;  %v3455_v43 = vld [vmem:[#allocation5 + $0xc8] ss:$16 sps:$4 sm:$0xff]   ;;  %v3469_v47 = vld [vmem:[#allocation5 + $0x10c] ss:$16 sps:$4 sm:$0xff]  }
  0x51   :  { %316 = vmatpush1.bf16.msra.mxu1 %v2983_v44  ;;  %v3463_v44 = vld [vmem:[#allocation5 + $0xec] ss:$16 sps:$4 sm:$0xff]   ;;  %v3461_v46 = vld [vmem:[#allocation5 + $0xe8] ss:$16 sps:$4 sm:$0xff]   ;;  %v3502_v59 = vld [vmem:[#allocation5 + $0x1c4] ss:$16 sps:$4 sm:$0xff]  }
  0x52   :  { %317 = vmatprep.subr.bf16.mxu1 %v2992_v45  ;;  %2105 = vmatpush1.bf16.msra.mxu0 %v3422_v54  ;;  %v3494_v45 = vld [vmem:[#allocation5 + $0x1a0] ss:$16 sps:$4 sm:$0xff]   ;;  %v3467_v48 = vld [vmem:[#allocation5 + $0x108] ss:$16 sps:$4 sm:$0xff]   ;;  %v3475_v49 = vld [vmem:[#allocation5 + $0x12c] ss:$16 sps:$4 sm:$0xff]  }
  0x53   :  { %2106 = vmatprep.subr.bf16.mxu0 %v3430_v55  ;;  %v3479_v52 = vld [vmem:[#allocation5 + $0x148] ss:$16 sps:$4 sm:$0xff]   ;;  %v3487_v53 = vld [vmem:[#allocation5 + $0x16c] ss:$16 sps:$4 sm:$0xff]   ;;  %v3506_v1 = vld [vmem:[#allocation5 + $0x1e0] ss:$16 sps:$4 sm:$0xff]  }
  0x54   :  { %v3485_v54 = vld [vmem:[#allocation5 + $0x168] ss:$16 sps:$4 sm:$0xff]   ;;  %v3493_v55 = vld [vmem:[#allocation5 + $0x18c] ss:$16 sps:$4 sm:$0xff]  }
  0x55   :  { %318 = vmatpush1.bf16.msra.mxu1 %v2991_v50  ;;  %v3473_v50 = vld [vmem:[#allocation5 + $0x128] ss:$16 sps:$4 sm:$0xff]   ;;  %v3511_v2 = vld [vmem:[#allocation5 + $0x1ec] ss:$16 sps:$4 sm:$0xff]  }
  0x56   :  { %319 = vmatprep.subr.bf16.mxu1 %v3000_v51  ;;  %2107 = vmatpush1.bf16.msra.mxu0 %v3428_v60  ;;  %v3481_v51 = vld [vmem:[#allocation5 + $0x14c] ss:$16 sps:$4 sm:$0xff]   ;;  %v3497_v58 = vld [vmem:[#allocation5 + $0x1a8] ss:$16 sps:$4 sm:$0xff]   ;;  %v3500_v60 = vld [vmem:[#allocation5 + $0x1c0] ss:$16 sps:$4 sm:$0xff]  }
  0x57   :  { %2108 = vmatprep.subr.bf16.mxu0 %v3436_v61  ;;  %v3505_v61 = vld [vmem:[#allocation5 + $0x1cc] ss:$16 sps:$4 sm:$0xff]  }
  0x59   :  { %320 = vmatpush1.bf16.msra.mxu1 %v2999_v56  ;;  %v3491_v56 = vld [vmem:[#allocation5 + $0x188] ss:$16 sps:$4 sm:$0xff]  }
  0x5a   :  { %395 = vmatprep.subr.bf16.mxu1 %v2980_v57  ;;  %2109 = vmatpush1.bf16.msra.mxu0 %v3434_v3  ;;  %v3499_v57 = vld [vmem:[#allocation5 + $0x1ac] ss:$16 sps:$4 sm:$0xff]   ;;  %v3509_v3 = vld [vmem:[#allocation5 + $0x1e8] ss:$16 sps:$4 sm:$0xff]  }
  0x5b   :  { %2110 = vmatprep.subr.bf16.mxu0 %v3442_v4  ;;  %v3514_v4 = vld [vmem:[#allocation5 + $0x204] ss:$16 sps:$4 sm:$0xff]  }
  0x5c   :  { %3006 = vmatmul.mubr.msk.bf16.vlgmr.msra.gmra.mrb[4].mxu1 %vm268_vm0, %v4038_v37 }
  0x5d   :  { %396 = vmatpush1.bf16.msra.mxu1 %v2979_v62  ;;  %427 = vmatprep.mubr.bf16.mxu1 %v3943_v0  ;;  %v3503_v62 = vld [vmem:[#allocation5 + $0x1c8] ss:$16 sps:$4 sm:$0xff]  }
  0x5e   :  { %397 = vmatprep.subr.bf16.mxu1 %v2988_v63  ;;  %2111 = vmatpush1.bf16.msra.mxu0 %v3440_v9  ;;  %v3508_v63 = vld [vmem:[#allocation5 + $0x1e4] ss:$16 sps:$4 sm:$0xff]  }
  0x5f   :  { %2112 = vmatprep.subr.bf16.mxu0 %v3448_v10  ;;  %v4058_v9 = vld [vmem:[%s4191_s2] sm:$0xff] }
  0x61   :  { %398 = vmatpush1.bf16.msra.mxu1 %v2987_v5  ;;  %v3517_v5 = vld [vmem:[#allocation5 + $0x20c] ss:$16 sps:$4 sm:$0xff]  }
  0x62   :  { %399 = vmatprep.subr.bf16.mxu1 %v2996_v6  ;;  %2113 = vmatpush1.bf16.msra.mxu0 %v3446_v13  ;;  %v446_v6 = vlaneseq }
  0x63   :  { %2114 = vmatprep.subr.bf16.mxu0 %v3454_v14 }
  0x64   :  { %v4050_v7 = vshrl.u32 %v446_v6, 7  ;;  %v3548_v6 = vld [vmem:[#allocation5 + $0x2c0] ss:$16 sps:$4 sm:$0xff]  }
  0x65   :  { %400 = vmatpush1.bf16.msra.mxu1 %v2995_v11 }
  0x66   :  { %401 = vmatprep.subr.bf16.mxu1 %v3004_v12  ;;  %2115 = vmatpush1.bf16.msra.mxu0 %v3452_v18  ;;  %v4053_v8 = vsub.s32 0, %v4050_v7  ;;  %v452_v10 = vsub.s32 1, %v4050_v7 }
  0x67   :  { %2116 = vmatprep.subr.bf16.mxu0 %v3460_v20  ;;  %v460_v20 = vsub.s32 3, %v4050_v7 }
  0x68   :  { %v449_v11 = vrot.slane %v4058_v9, %v4053_v8  ;;  %v453_v12 = vrot.slane %v4058_v9, %v452_v10 }
  0x69   :  { %402 = vmatpush1.bf16.msra.mxu1 %v3003_v15 }
  0x6a   :  { %2266 = vmatprep.subr.bf16.mxu1 %v3421_v16  ;;  %2117 = vmatpush1.bf16.msra.mxu0 %v3458_v21  ;;  %v486_v13 = vpack.c.bf16 %v449_v11, %v449_v11  ;;  %v487_v14 = vpack.c.bf16 %v453_v12, %v453_v12  ;;  %v3551_v11 = vld [vmem:[#allocation5 + $0x2c8] ss:$16 sps:$4 sm:$0xff]   ;;  %v3556_v12 = vld [vmem:[#allocation5 + $0x2e4] ss:$16 sps:$4 sm:$0xff]  }
  0x6b   :  { %2118 = vmatprep.subr.bf16.mxu0 %v3466_v22 }
  0x6c   :  { %3008 = vmatmul.mubr.msk.bf16.vlgmr.msra.gmra.mrb[8].mxu1 %vm268_vm0, %v4038_v37  ;;  %v3482_v37 = vld [vmem:[#allocation5 + $0x160] ss:$16 sps:$4 sm:$0xff]   ;;  %v495_v15 = vpack.i.b16 %v486_v13, %v486_v13  ;;  %v502_v16 = vpack.i.b16 %v487_v14, %v487_v14  ;;  %v3559_v13 = vld [vmem:[#allocation5 + $0x2ec] ss:$16 sps:$4 sm:$0xff]  }
  0x6d   :  { %2267 = vmatpush1.bf16.msra.mxu1 %v3419_v17 }
  0x6e   :  { %2268 = vmatprep.subr.bf16.mxu1 %v3427_v19  ;;  %2119 = vmatpush1.bf16.msra.mxu0 %v3464_v25  ;;  %v500_v17 = vrot.slane %v495_v15, %v4053_v8  ;;  %v507_v19 = vrot.slane %v502_v16, %v4053_v8  ;;  %v3554_v16 = vld [vmem:[#allocation5 + $0x2e0] ss:$16 sps:$4 sm:$0xff]  }
  0x6f   :  { %2120 = vmatprep.subr.bf16.mxu0 %v3472_v26 }
  0x71   :  { %2269 = vmatpush1.bf16.msra.mxu1 %v3425_v23 }
  0x72   :  { %2270 = vmatprep.subr.bf16.mxu1 %v3433_v24  ;;  %2121 = vmatpush1.bf16.msra.mxu0 %v3470_v29 }
  0x73   :  { %2122 = vmatprep.subr.bf16.mxu0 %v3478_v30  ;;  %v3512_v30 = vld [vmem:[#allocation5 + $0x200] ss:$16 sps:$4 sm:$0xff]  }
  0x75   :  { %2271 = vmatpush1.bf16.msra.mxu1 %v3431_v27 }
  0x76   :  { %2272 = vmatprep.subr.bf16.mxu1 %v3439_v28  ;;  %2123 = vmatpush1.bf16.msra.mxu0 %v3476_v33  ;;  %v461_v28 = vrot.slane %v4058_v9, %v460_v20 }
  0x77   :  { %2124 = vmatprep.subr.bf16.mxu0 %v3484_v34  ;;  %v3520_v34 = vld [vmem:[#allocation5 + $0x224] ss:$16 sps:$4 sm:$0xff]  }
  0x79   :  { %2273 = vmatpush1.bf16.msra.mxu1 %v3437_v31  ;;  %v3515_v31 = vld [vmem:[#allocation5 + $0x208] ss:$16 sps:$4 sm:$0xff]  }
  0x7a   :  { %2274 = vmatprep.subr.bf16.mxu1 %v3445_v32  ;;  %2125 = vmatpush1.bf16.msra.mxu0 %v3482_v37  ;;  %v489_v37 = vpack.c.bf16 %v461_v28, %v461_v28  ;;  %v3569_v28 = vld [vmem:[#allocation5 + $0x328] ss:$16 sps:$4 sm:$0xff]  }
  0x7b   :  { %2126 = vmatprep.subr.bf16.mxu0 %v3490_v38 }
  0x7d   :  { %2275 = vmatpush1.bf16.msra.mxu1 %v3443_v35  ;;  %v3523_v35 = vld [vmem:[#allocation5 + $0x22c] ss:$16 sps:$4 sm:$0xff]  }
  0x7e   :  { %2276 = vmatprep.subr.bf16.mxu1 %v3451_v36  ;;  %2127 = vmatpush1.bf16.msra.mxu0 %v3488_v41  ;;  %v3521_v41 = vld [vmem:[#allocation5 + $0x228] ss:$16 sps:$4 sm:$0xff]  }
  0x7f   :  { %2128 = vmatprep.subr.bf16.mxu0 %v3496_v42  ;;  %v3526_v42 = vld [vmem:[#allocation5 + $0x244] ss:$16 sps:$4 sm:$0xff]  }
  0x81   :  { %2277 = vmatpush1.bf16.msra.mxu1 %v3449_v39 }
  0x82   :  { %2278 = vmatprep.subr.bf16.mxu1 %v3457_v40  ;;  %2129 = vmatpush1.bf16.msra.mxu0 %v3494_v45  ;;  %v3518_v40 = vld [vmem:[#allocation5 + $0x220] ss:$16 sps:$4 sm:$0xff]  }
  0x83   :  { %2130 = vmatprep.subr.bf16.mxu0 %v3502_v59  ;;  %v3524_v45 = vld [vmem:[#allocation5 + $0x240] ss:$16 sps:$4 sm:$0xff]  }
  0x85   :  { %2279 = vmatpush1.bf16.msra.mxu1 %v3455_v43  ;;  %v3529_v43 = vld [vmem:[#allocation5 + $0x24c] ss:$16 sps:$4 sm:$0xff]  }
  0x86   :  { %2280 = vmatprep.subr.bf16.mxu1 %v3463_v44  ;;  %2131 = vmatpush1.bf16.msra.mxu0 %v3500_v60  ;;  %v516_v44 = vpack.i.b16 %v489_v37, %v489_v37  ;;  %v3536_v60 = vld [vmem:[#allocation5 + $0x280] ss:$16 sps:$4 sm:$0xff]   ;;  %v3583_v37 = vld [vmem:[#allocation5 + $0x36c] ss:$16 sps:$4 sm:$0xff]  }
  0x87   :  { %2132 = vmatprep.subr.bf16.mxu0 %v3508_v63  ;;  %v3544_v63 = vld [vmem:[#allocation5 + $0x2a4] ss:$16 sps:$4 sm:$0xff]  }
  0x89   :  { %2281 = vmatpush1.bf16.msra.mxu1 %v3461_v46  ;;  %v3527_v46 = vld [vmem:[#allocation5 + $0x248] ss:$16 sps:$4 sm:$0xff]  }
  0x8a   :  { %2282 = vmatprep.subr.bf16.mxu1 %v3469_v47  ;;  %2133 = vmatpush1.bf16.msra.mxu0 %v3506_v1  ;;  %v3532_v47 = vld [vmem:[#allocation5 + $0x264] ss:$16 sps:$4 sm:$0xff]   ;;  %v3547_v1 = vld [vmem:[#allocation5 + $0x2ac] ss:$16 sps:$4 sm:$0xff]  }
  0x8b   :  { %2143 = vmatprep.subr.bf16.mxu0 %v3514_v4  ;;  %v3550_v4 = vld [vmem:[#allocation5 + $0x2c4] ss:$16 sps:$4 sm:$0xff]  }
  0x8d   :  { %2283 = vmatpush1.bf16.msra.mxu1 %v3467_v48  ;;  %v3535_v48 = vld [vmem:[#allocation5 + $0x26c] ss:$16 sps:$4 sm:$0xff]  }
  0x8e   :  { %2284 = vmatprep.subr.bf16.mxu1 %v3475_v49 }
  0x91   :  { %2285 = vmatpush1.bf16.msra.mxu1 %v3473_v50  ;;  %v521_v50 = vrot.slane %v516_v44, %v4053_v8 }
  0x92   :  { %2286 = vmatprep.subr.bf16.mxu1 %v3481_v51 }
  0x95   :  { %2287 = vmatpush1.bf16.msra.mxu1 %v3479_v52  ;;  %v3530_v52 = vld [vmem:[#allocation5 + $0x260] ss:$16 sps:$4 sm:$0xff]  }
  0x96   :  { %2288 = vmatprep.subr.bf16.mxu1 %v3487_v53  ;;  %v3533_v53 = vld [vmem:[#allocation5 + $0x268] ss:$16 sps:$4 sm:$0xff]  }
  0x99   :  { %2289 = vmatpush1.bf16.msra.mxu1 %v3485_v54 }
  0x9a   :  { %2290 = vmatprep.subr.bf16.mxu1 %v3493_v55 }
  0x9d   :  { %2291 = vmatpush1.bf16.msra.mxu1 %v3491_v56  ;;  %v3538_v56 = vld [vmem:[#allocation5 + $0x284] ss:$16 sps:$4 sm:$0xff]  }
  0x9e   :  { %2292 = vmatprep.subr.bf16.mxu1 %v3499_v57  ;;  %v3541_v57 = vld [vmem:[#allocation5 + $0x28c] ss:$16 sps:$4 sm:$0xff]  }
  0xa1   :  { %2293 = vmatpush1.bf16.msra.mxu1 %v3497_v58 }
  0xa2   :  { %2294 = vmatprep.subr.bf16.mxu1 %v3505_v61  ;;  %v3539_v61 = vld [vmem:[#allocation5 + $0x288] ss:$16 sps:$4 sm:$0xff]  }
  0xa5   :  { %2295 = vmatpush1.bf16.msra.mxu1 %v3503_v62 }
  0xa6   :  { %2296 = vmatprep.subr.bf16.mxu1 %v3511_v2  ;;  %v3542_v2 = vld [vmem:[#allocation5 + $0x2a0] ss:$16 sps:$4 sm:$0xff]  }
  0xa9   :  { %2297 = vmatpush1.bf16.msra.mxu1 %v3509_v3  ;;  %v3545_v3 = vld [vmem:[#allocation5 + $0x2a8] ss:$16 sps:$4 sm:$0xff]  }
  0xaa   :  { %2307 = vmatprep.subr.bf16.mxu1 %v3517_v5  ;;  %v3553_v5 = vld [vmem:[#allocation5 + $0x2cc] ss:$16 sps:$4 sm:$0xff]  }
 0x11f   :  { %v306_v18 = vpop.f32.mrb[0].mxu1  ;;  %v4073_v32 = vpop.f32.mrb[0].mxu0 }
 0x120   :  { %v436_v21 = vpack.c.bf16 %v306_v18, %v306_v18  ;;  %v308_v22 = vpop.f32.mrb[1].mxu1  ;;  %v4076_v36 = vpop.f32.mrb[1].mxu0 }
 0x121   :  { %v437_v23 = vpack.c.bf16 %v308_v22, %v308_v22  ;;  %v310_v24 = vpop.f32.mrb[2].mxu1  ;;  %v392_v38 = vpop.f32.mrb[2].mxu0 }
 0x122   :  { %v550_v25 = vadd.bf16 %v500_v17, %v436_v21  ;;  %v311_v26 = vpop.f32.mrb[3].mxu1  ;;  %v393_v39 = vpop.f32.mrb[3].mxu0  ;;  %v3557_v17 = vld [vmem:[#allocation5 + $0x2e8] ss:$16 sps:$4 sm:$0xff]   ;;  %v3565_v21 = vld [vmem:[#allocation5 + $0x30c] ss:$16 sps:$4 sm:$0xff]  }
 0x123   :  { %v551_v27 = vadd.bf16 %v507_v19, %v437_v23  ;;  %v3562_v19 = vld [vmem:[#allocation5 + $0x304] ss:$16 sps:$4 sm:$0xff]   ;;  %v3560_v23 = vld [vmem:[#allocation5 + $0x300] ss:$16 sps:$4 sm:$0xff]   ;;  %v3563_v24 = vld [vmem:[#allocation5 + $0x308] ss:$16 sps:$4 sm:$0xff]  }
 0x124   :  { %v558_v33 = vmax.bf16 %v3943_v0, %v550_v25  ;;  %v3568_v25 = vld [vmem:[#allocation5 + $0x324] ss:$16 sps:$4 sm:$0xff]   ;;  %v3571_v26 = vld [vmem:[#allocation5 + $0x32c] ss:$16 sps:$4 sm:$0xff]   ;;  %v468_v38 = vsub.s32 5, %v4050_v7 }
 0x125   :  { %v559_v29 = vmax.bf16 %v3943_v0, %v551_v27  ;;  %v3566_v27 = vld [vmem:[#allocation5 + $0x320] ss:$16 sps:$4 sm:$0xff]  }
 0x126   :  { %v469_v44 = vrot.slane %v4058_v9, %v468_v38  ;;  %v3643_v38 = vld [vmem:[#allocation5 + $0x4ac] ss:$16 sps:$4 sm:$0xff]  }
 0x127   :  { %2134 = vmatprep.mubr.bf16.mxu0 %v559_v29  ;;  %2298 = vmatprep.mubr.bf16.mxu1 %v559_v29  ;;  %v3574_v29 = vld [vmem:[#allocation5 + $0x344] ss:$16 sps:$4 sm:$0xff]  }
 0x128   :  { %2135 = vmatmul.mubr.bf16.vlgmr.msra.gmra.mrb[4].mxu0 %v558_v33  ;;  %2299 = vmatmul.mubr.bf16.vlgmr.msra.gmra.mrb[12].mxu1 %v558_v33  ;;  %v3572_v33 = vld [vmem:[#allocation5 + $0x340] ss:$16 sps:$4 sm:$0xff]  }
 0x129   :  { %2144 = vmatpush1.bf16.msra.mxu0 %v3512_v30  ;;  %2308 = vmatpush1.bf16.msra.mxu1 %v3515_v31  ;;  %v3577_v30 = vld [vmem:[#allocation5 + $0x34c] ss:$16 sps:$4 sm:$0xff]   ;;  %v456_v31 = vsub.s32 2, %v4050_v7 }
 0x12a   :  { %2145 = vmatprep.subr.bf16.mxu0 %v3520_v34  ;;  %2309 = vmatprep.subr.bf16.mxu1 %v3523_v35  ;;  %v3575_v34 = vld [vmem:[#allocation5 + $0x348] ss:$16 sps:$4 sm:$0xff]   ;;  %v3580_v35 = vld [vmem:[#allocation5 + $0x364] ss:$16 sps:$4 sm:$0xff]  }
 0x12b   :  { %v457_v39 = vrot.slane %v4058_v9, %v456_v31 }
 0x12d   :  { %2146 = vmatpush1.bf16.msra.mxu0 %v3518_v40  ;;  %2310 = vmatpush1.bf16.msra.mxu1 %v3521_v41  ;;  %v3578_v40 = vld [vmem:[#allocation5 + $0x360] ss:$16 sps:$4 sm:$0xff]   ;;  %v3581_v41 = vld [vmem:[#allocation5 + $0x368] ss:$16 sps:$4 sm:$0xff]  }
 0x12e   :  { %2147 = vmatprep.subr.bf16.mxu0 %v3526_v42  ;;  %2311 = vmatprep.subr.bf16.mxu1 %v3529_v43  ;;  %v3586_v42 = vld [vmem:[#allocation5 + $0x384] ss:$16 sps:$4 sm:$0xff]   ;;  %v3589_v43 = vld [vmem:[#allocation5 + $0x38c] ss:$16 sps:$4 sm:$0xff]  }
 0x12f   :  { %v4078_v49 = vpop.f32.mrb[4].mxu1 }
 0x130   :  { %v349_v51 = vpop.f32.mrb[5].mxu1 }
 0x131   :  { %2148 = vmatpush1.bf16.msra.mxu0 %v3524_v45  ;;  %2312 = vmatpush1.bf16.msra.mxu1 %v3527_v46  ;;  %v439_v54 = vpack.c.bf16 %v349_v51, %v349_v51  ;;  %v351_v55 = vpop.f32.mrb[6].mxu1  ;;  %v488_v45 = vpack.c.bf16 %v457_v39, %v457_v39  ;;  %v3584_v46 = vld [vmem:[#allocation5 + $0x380] ss:$16 sps:$4 sm:$0xff]   ;;  %v491_v51 = vpack.c.bf16 %v469_v44, %v469_v44  ;;  %v3647_v44 = vld [vmem:[#allocation5 + $0x4c8] ss:$16 sps:$4 sm:$0xff]  }
 0x132   :  { %2149 = vmatprep.subr.bf16.mxu0 %v3532_v47  ;;  %2313 = vmatprep.subr.bf16.mxu1 %v3535_v48  ;;  %v352_v58 = vpop.f32.mrb[7].mxu1  ;;  %v3587_v47 = vld [vmem:[#allocation5 + $0x388] ss:$16 sps:$4 sm:$0xff]   ;;  %v3592_v48 = vld [vmem:[#allocation5 + $0x3a4] ss:$16 sps:$4 sm:$0xff]  }
 0x133   :  { %v553_v59 = vadd.bf16 %v521_v50, %v439_v54  ;;  %v3595_v50 = vld [vmem:[#allocation5 + $0x3ac] ss:$16 sps:$4 sm:$0xff]   ;;  %v3593_v54 = vld [vmem:[#allocation5 + $0x3a8] ss:$16 sps:$4 sm:$0xff]   ;;  %v3598_v55 = vld [vmem:[#allocation5 + $0x3c4] ss:$16 sps:$4 sm:$0xff]   ;;  %v438_v58 = vpack.c.bf16 %v4078_v49, %v4078_v49 }
 0x134   :  { %v3605_v49 = vld [vmem:[#allocation5 + $0x3e8] ss:$16 sps:$4 sm:$0xff]   ;;  %v3638_v39 = vld [vmem:[#allocation5 + $0x4a0] ss:$16 sps:$4 sm:$0xff]  }
 0x135   :  { %2150 = vmatpush1.bf16.msra.mxu0 %v3530_v52  ;;  %2314 = vmatpush1.bf16.msra.mxu1 %v3533_v53  ;;  %v561_v62 = vmax.bf16 %v3943_v0, %v553_v59  ;;  %v509_v52 = vpack.i.b16 %v488_v45, %v488_v45  ;;  %v3590_v53 = vld [vmem:[#allocation5 + $0x3a0] ss:$16 sps:$4 sm:$0xff]   ;;  %v3652_v45 = vld [vmem:[#allocation5 + $0x4e4] ss:$16 sps:$4 sm:$0xff]  }
 0x136   :  { %2151 = vmatprep.subr.bf16.mxu0 %v3538_v56  ;;  %2315 = vmatprep.subr.bf16.mxu1 %v3541_v57  ;;  %v3601_v56 = vld [vmem:[#allocation5 + $0x3cc] ss:$16 sps:$4 sm:$0xff]   ;;  %v530_v57 = vpack.i.b16 %v491_v51, %v491_v51 }
 0x137   :  { %2175 = vmatprep.mubr.bf16.mxu0 %v561_v62  ;;  %2339 = vmatprep.mubr.bf16.mxu1 %v561_v62  ;;  %v514_v59 = vrot.slane %v509_v52, %v4053_v8  ;;  %v3604_v62 = vld [vmem:[#allocation5 + $0x3e4] ss:$16 sps:$4 sm:$0xff]   ;;  %v3661_v51 = vld [vmem:[#allocation5 + $0x50c] ss:$16 sps:$4 sm:$0xff]   ;;  %v3656_v52 = vld [vmem:[#allocation5 + $0x500] ss:$16 sps:$4 sm:$0xff]  }
 0x139   :  { %2152 = vmatpush1.bf16.msra.mxu0 %v3536_v60  ;;  %2316 = vmatpush1.bf16.msra.mxu1 %v3539_v61  ;;  %v3596_v60 = vld [vmem:[#allocation5 + $0x3c0] ss:$16 sps:$4 sm:$0xff]   ;;  %v3599_v61 = vld [vmem:[#allocation5 + $0x3c8] ss:$16 sps:$4 sm:$0xff]  }
 0x13a   :  { %2153 = vmatprep.subr.bf16.mxu0 %v3544_v63  ;;  %2317 = vmatprep.subr.bf16.mxu1 %v3547_v1  ;;  %v3607_v63 = vld [vmem:[#allocation5 + $0x3ec] ss:$16 sps:$4 sm:$0xff]   ;;  %v441_v1 = vpack.c.bf16 %v4076_v36, %v4076_v36  ;;  %v3616_v36 = vld [vmem:[#allocation5 + $0x424] ss:$16 sps:$4 sm:$0xff]  }
 0x13d   :  { %2154 = vmatpush1.bf16.msra.mxu0 %v3542_v2  ;;  %2318 = vmatpush1.bf16.msra.mxu1 %v3545_v3  ;;  %v535_v2 = vrot.slane %v530_v57, %v4053_v8  ;;  %v552_v3 = vadd.bf16 %v514_v59, %v438_v58  ;;  %v3665_v57 = vld [vmem:[#allocation5 + $0x528] ss:$16 sps:$4 sm:$0xff]   ;;  %v3670_v58 = vld [vmem:[#allocation5 + $0x544] ss:$16 sps:$4 sm:$0xff]   ;;  %v3673_v59 = vld [vmem:[#allocation5 + $0x54c] ss:$16 sps:$4 sm:$0xff]  }
 0x13e   :  { %2155 = vmatprep.subr.bf16.mxu0 %v3550_v4  ;;  %2319 = vmatprep.subr.bf16.mxu1 %v3553_v5  ;;  %v3602_v4 = vld [vmem:[#allocation5 + $0x3e0] ss:$16 sps:$4 sm:$0xff]   ;;  %v3610_v5 = vld [vmem:[#allocation5 + $0x404] ss:$16 sps:$4 sm:$0xff]  }
 0x13f   :  { %v4082_v14 = vpop.f32.mrb[8].mxu1 }
 0x140   :  { %v4084_v15 = vpop.f32.mrb[9].mxu1 }
 0x141   :  { %2156 = vmatpush1.bf16.msra.mxu0 %v3548_v6  ;;  %2320 = vmatpush1.bf16.msra.mxu1 %v3551_v11  ;;  %v433_v18 = vpop.f32.mrb[10].mxu1  ;;  %v3613_v6 = vld [vmem:[#allocation5 + $0x40c] ss:$16 sps:$4 sm:$0xff]   ;;  %v555_v11 = vadd.bf16 %v535_v2, %v441_v1  ;;  %v476_v2 = vsub.s32 7, %v4050_v7 }
 0x142   :  { %2157 = vmatprep.subr.bf16.mxu0 %v3556_v12  ;;  %2321 = vmatprep.subr.bf16.mxu1 %v3559_v13  ;;  %v434_v22 = vpop.f32.mrb[11].mxu1  ;;  %v560_v12 = vmax.bf16 %v3943_v0, %v552_v3  ;;  %v3608_v13 = vld [vmem:[#allocation5 + $0x400] ss:$16 sps:$4 sm:$0xff]   ;;  %v3679_v1 = vld [vmem:[#allocation5 + $0x56c] ss:$16 sps:$4 sm:$0xff]  }
 0x143   :  { %v563_v18 = vmax.bf16 %v3943_v0, %v555_v11  ;;  %v3622_v22 = vld [vmem:[#allocation5 + $0x444] ss:$16 sps:$4 sm:$0xff]   ;;  %v477_v11 = vrot.slane %v4058_v9, %v476_v2  ;;  %v3737_v2 = vld [vmem:[#allocation5 + $0x6a8] ss:$16 sps:$4 sm:$0xff]  }
 0x145   :  { %2158 = vmatpush1.bf16.msra.mxu0 %v3554_v16  ;;  %2322 = vmatpush1.bf16.msra.mxu1 %v3557_v17  ;;  %v3611_v16 = vld [vmem:[#allocation5 + $0x408] ss:$16 sps:$4 sm:$0xff]   ;;  %v3619_v17 = vld [vmem:[#allocation5 + $0x42c] ss:$16 sps:$4 sm:$0xff]  }
 0x146   :  { %2159 = vmatprep.subr.bf16.mxu0 %v3562_v19  ;;  %2323 = vmatprep.subr.bf16.mxu1 %v3565_v21  ;;  %v3614_v19 = vld [vmem:[#allocation5 + $0x420] ss:$16 sps:$4 sm:$0xff]   ;;  %v3617_v21 = vld [vmem:[#allocation5 + $0x428] ss:$16 sps:$4 sm:$0xff]  }
 0x149   :  { %2160 = vmatpush1.bf16.msra.mxu0 %v3560_v23  ;;  %2324 = vmatpush1.bf16.msra.mxu1 %v3563_v24  ;;  %v3625_v23 = vld [vmem:[#allocation5 + $0x44c] ss:$16 sps:$4 sm:$0xff]   ;;  %v3620_v24 = vld [vmem:[#allocation5 + $0x440] ss:$16 sps:$4 sm:$0xff]  }
 0x14a   :  { %2161 = vmatprep.subr.bf16.mxu0 %v3568_v25  ;;  %2325 = vmatprep.subr.bf16.mxu1 %v3571_v26  ;;  %v3623_v25 = vld [vmem:[#allocation5 + $0x448] ss:$16 sps:$4 sm:$0xff]   ;;  %v3628_v26 = vld [vmem:[#allocation5 + $0x464] ss:$16 sps:$4 sm:$0xff]  }
 0x14d   :  { %2162 = vmatpush1.bf16.msra.mxu0 %v3566_v27  ;;  %2326 = vmatpush1.bf16.msra.mxu1 %v3569_v28  ;;  %v3631_v27 = vld [vmem:[#allocation5 + $0x46c] ss:$16 sps:$4 sm:$0xff]   ;;  %v3626_v28 = vld [vmem:[#allocation5 + $0x460] ss:$16 sps:$4 sm:$0xff]  }
 0x14e   :  { %2163 = vmatprep.subr.bf16.mxu0 %v3574_v29  ;;  %2327 = vmatprep.subr.bf16.mxu1 %v3577_v30  ;;  %v3629_v29 = vld [vmem:[#allocation5 + $0x468] ss:$16 sps:$4 sm:$0xff]   ;;  %v3634_v30 = vld [vmem:[#allocation5 + $0x484] ss:$16 sps:$4 sm:$0xff]  }
 0x151   :  { %2164 = vmatpush1.bf16.msra.mxu0 %v3572_v33  ;;  %2328 = vmatpush1.bf16.msra.mxu1 %v3575_v34  ;;  %v3637_v33 = vld [vmem:[#allocation5 + $0x48c] ss:$16 sps:$4 sm:$0xff]   ;;  %v3632_v34 = vld [vmem:[#allocation5 + $0x480] ss:$16 sps:$4 sm:$0xff]  }
 0x152   :  { %2165 = vmatprep.subr.bf16.mxu0 %v3580_v35  ;;  %2329 = vmatprep.subr.bf16.mxu1 %v3583_v37  ;;  %v3635_v35 = vld [vmem:[#allocation5 + $0x488] ss:$16 sps:$4 sm:$0xff]   ;;  %v3640_v37 = vld [vmem:[#allocation5 + $0x4a4] ss:$16 sps:$4 sm:$0xff]  }
 0x155   :  { %2166 = vmatpush1.bf16.msra.mxu0 %v3578_v40  ;;  %2330 = vmatpush1.bf16.msra.mxu1 %v3581_v41  ;;  %v3641_v40 = vld [vmem:[#allocation5 + $0x4a8] ss:$16 sps:$4 sm:$0xff]   ;;  %v3646_v41 = vld [vmem:[#allocation5 + $0x4c4] ss:$16 sps:$4 sm:$0xff]  }
 0x156   :  { %2167 = vmatprep.subr.bf16.mxu0 %v3586_v42  ;;  %2331 = vmatprep.subr.bf16.mxu1 %v3589_v43  ;;  %v3649_v42 = vld [vmem:[#allocation5 + $0x4cc] ss:$16 sps:$4 sm:$0xff]   ;;  %v3644_v43 = vld [vmem:[#allocation5 + $0x4c0] ss:$16 sps:$4 sm:$0xff]  }
 0x159   :  { %2168 = vmatpush1.bf16.msra.mxu0 %v3584_v46  ;;  %2332 = vmatpush1.bf16.msra.mxu1 %v3587_v47  ;;  %v3655_v46 = vld [vmem:[#allocation5 + $0x4ec] ss:$16 sps:$4 sm:$0xff]   ;;  %v3650_v47 = vld [vmem:[#allocation5 + $0x4e0] ss:$16 sps:$4 sm:$0xff]  }
 0x15a   :  { %2169 = vmatprep.subr.bf16.mxu0 %v3592_v48  ;;  %2333 = vmatprep.subr.bf16.mxu1 %v3595_v50  ;;  %v3653_v48 = vld [vmem:[#allocation5 + $0x4e8] ss:$16 sps:$4 sm:$0xff]   ;;  %v3658_v50 = vld [vmem:[#allocation5 + $0x504] ss:$16 sps:$4 sm:$0xff]  }
 0x15d   :  { %2170 = vmatpush1.bf16.msra.mxu0 %v3590_v53  ;;  %2334 = vmatpush1.bf16.msra.mxu1 %v3593_v54  ;;  %v3659_v53 = vld [vmem:[#allocation5 + $0x508] ss:$16 sps:$4 sm:$0xff]   ;;  %v3664_v54 = vld [vmem:[#allocation5 + $0x524] ss:$16 sps:$4 sm:$0xff]  }
 0x15e   :  { %2171 = vmatprep.subr.bf16.mxu0 %v3598_v55  ;;  %2335 = vmatprep.subr.bf16.mxu1 %v3601_v56  ;;  %v3667_v55 = vld [vmem:[#allocation5 + $0x52c] ss:$16 sps:$4 sm:$0xff]   ;;  %v3662_v56 = vld [vmem:[#allocation5 + $0x520] ss:$16 sps:$4 sm:$0xff]  }
 0x161   :  { %2172 = vmatpush1.bf16.msra.mxu0 %v3596_v60  ;;  %2336 = vmatpush1.bf16.msra.mxu1 %v3599_v61  ;;  %v464_v60 = vsub.s32 4, %v4050_v7  ;;  %v3668_v61 = vld [vmem:[#allocation5 + $0x540] ss:$16 sps:$4 sm:$0xff]  }
 0x162   :  { %2173 = vmatprep.subr.bf16.mxu0 %v3604_v62  ;;  %2337 = vmatprep.subr.bf16.mxu1 %v3607_v63  ;;  %v3671_v62 = vld [vmem:[#allocation5 + $0x548] ss:$16 sps:$4 sm:$0xff]   ;;  %v3676_v63 = vld [vmem:[#allocation5 + $0x564] ss:$16 sps:$4 sm:$0xff]  }
 0x163   :  { %v465_v3 = vrot.slane %v4058_v9, %v464_v60  ;;  %v3728_v60 = vld [vmem:[#allocation5 + $0x680] ss:$16 sps:$4 sm:$0xff]  }
 0x165   :  { %2174 = vmatpush1.bf16.msra.mxu0 %v3602_v4  ;;  %2338 = vmatpush1.bf16.msra.mxu1 %v3605_v49  ;;  %v3674_v4 = vld [vmem:[#allocation5 + $0x560] ss:$16 sps:$4 sm:$0xff]   ;;  %v3677_v49 = vld [vmem:[#allocation5 + $0x568] ss:$16 sps:$4 sm:$0xff]  }
 0x166   :  { %2184 = vmatprep.subr.bf16.mxu0 %v3610_v5  ;;  %2348 = vmatprep.subr.bf16.mxu1 %v3613_v6  ;;  %v3682_v5 = vld [vmem:[#allocation5 + $0x584] ss:$16 sps:$4 sm:$0xff]   ;;  %v3685_v6 = vld [vmem:[#allocation5 + $0x58c] ss:$16 sps:$4 sm:$0xff]  }
 0x168   :  { %2176 = vmatmul.mubr.bf16.vlgmr.msra.gmra.mrb[4].mxu0 %v560_v12  ;;  %2340 = vmatmul.mubr.bf16.vlgmr.msra.gmra.mrb[12].mxu1 %v560_v12  ;;  %v490_v12 = vpack.c.bf16 %v465_v3, %v465_v3  ;;  %v3742_v3 = vld [vmem:[#allocation5 + $0x6c4] ss:$16 sps:$4 sm:$0xff]  }
 0x169   :  { %2185 = vmatpush1.bf16.msra.mxu0 %v3608_v13  ;;  %2349 = vmatpush1.bf16.msra.mxu1 %v3611_v16  ;;  %v3680_v13 = vld [vmem:[#allocation5 + $0x580] ss:$16 sps:$4 sm:$0xff]   ;;  %v3683_v16 = vld [vmem:[#allocation5 + $0x588] ss:$16 sps:$4 sm:$0xff]  }
 0x16a   :  { %2186 = vmatprep.subr.bf16.mxu0 %v3616_v36  ;;  %2350 = vmatprep.subr.bf16.mxu1 %v3619_v17  ;;  %v3688_v36 = vld [vmem:[#allocation5 + $0x5a4] ss:$16 sps:$4 sm:$0xff]   ;;  %v3691_v17 = vld [vmem:[#allocation5 + $0x5ac] ss:$16 sps:$4 sm:$0xff]  }
 0x16b   :  { %2216 = vmatprep.mubr.bf16.mxu0 %v563_v18  ;;  %2380 = vmatprep.mubr.bf16.mxu1 %v563_v18  ;;  %v493_v18 = vpack.c.bf16 %v477_v11, %v477_v11  ;;  %v3751_v11 = vld [vmem:[#allocation5 + $0x6ec] ss:$16 sps:$4 sm:$0xff]  }
 0x16d   :  { %2187 = vmatpush1.bf16.msra.mxu0 %v3614_v19  ;;  %2351 = vmatpush1.bf16.msra.mxu1 %v3617_v21  ;;  %v523_v19 = vpack.i.b16 %v490_v12, %v490_v12  ;;  %v3686_v21 = vld [vmem:[#allocation5 + $0x5a0] ss:$16 sps:$4 sm:$0xff]  }
 0x16e   :  { %2188 = vmatprep.subr.bf16.mxu0 %v3622_v22  ;;  %2352 = vmatprep.subr.bf16.mxu1 %v3625_v23  ;;  %v3689_v22 = vld [vmem:[#allocation5 + $0x5a8] ss:$16 sps:$4 sm:$0xff]   ;;  %v3694_v23 = vld [vmem:[#allocation5 + $0x5c4] ss:$16 sps:$4 sm:$0xff]   ;;  %v3746_v12 = vld [vmem:[#allocation5 + $0x6e0] ss:$16 sps:$4 sm:$0xff]  }
 0x171   :  { %2189 = vmatpush1.bf16.msra.mxu0 %v3620_v24  ;;  %2353 = vmatpush1.bf16.msra.mxu1 %v3623_v25  ;;  %v3697_v24 = vld [vmem:[#allocation5 + $0x5cc] ss:$16 sps:$4 sm:$0xff]   ;;  %v544_v25 = vpack.i.b16 %v493_v18, %v493_v18  ;;  %v3755_v18 = vld [vmem:[#allocation5 + $0x708] ss:$16 sps:$4 sm:$0xff]  }
 0x172   :  { %2190 = vmatprep.subr.bf16.mxu0 %v3628_v26  ;;  %2354 = vmatprep.subr.bf16.mxu1 %v3631_v27  ;;  %v440_v26 = vpack.c.bf16 %v4073_v32, %v4073_v32  ;;  %v528_v27 = vrot.slane %v523_v19, %v4053_v8  ;;  %v3701_v32 = vld [vmem:[#allocation5 + $0x5e8] ss:$16 sps:$4 sm:$0xff]   ;;  %v3760_v19 = vld [vmem:[#allocation5 + $0x724] ss:$16 sps:$4 sm:$0xff]  }
 0x175   :  { %2191 = vmatpush1.bf16.msra.mxu0 %v3626_v28  ;;  %2355 = vmatpush1.bf16.msra.mxu1 %v3629_v29  ;;  %v3692_v28 = vld [vmem:[#allocation5 + $0x5c0] ss:$16 sps:$4 sm:$0xff]   ;;  %v3695_v29 = vld [vmem:[#allocation5 + $0x5c8] ss:$16 sps:$4 sm:$0xff]  }
 0x176   :  { %2192 = vmatprep.subr.bf16.mxu0 %v3634_v30  ;;  %2356 = vmatprep.subr.bf16.mxu1 %v3637_v33  ;;  %v3700_v30 = vld [vmem:[#allocation5 + $0x5e4] ss:$16 sps:$4 sm:$0xff]   ;;  %v3703_v33 = vld [vmem:[#allocation5 + $0x5ec] ss:$16 sps:$4 sm:$0xff]  }
 0x179   :  { %2193 = vmatpush1.bf16.msra.mxu0 %v3632_v34  ;;  %2357 = vmatpush1.bf16.msra.mxu1 %v3635_v35  ;;  %v443_v34 = vpack.c.bf16 %v4084_v15, %v4084_v15  ;;  %v549_v35 = vrot.slane %v544_v25, %v4053_v8  ;;  %v3712_v15 = vld [vmem:[#allocation5 + $0x624] ss:$16 sps:$4 sm:$0xff]   ;;  %v3769_v25 = vld [vmem:[#allocation5 + $0x74c] ss:$16 sps:$4 sm:$0xff]  }
 0x17a   :  { %2194 = vmatprep.subr.bf16.mxu0 %v3640_v37  ;;  %2358 = vmatprep.subr.bf16.mxu1 %v3643_v38  ;;  %v554_v37 = vadd.bf16 %v528_v27, %v440_v26  ;;  %v3698_v38 = vld [vmem:[#allocation5 + $0x5e0] ss:$16 sps:$4 sm:$0xff]   ;;  %v3767_v27 = vld [vmem:[#allocation5 + $0x748] ss:$16 sps:$4 sm:$0xff]  }
 0x17b   :  { %v3764_v26 = vld [vmem:[#allocation5 + $0x740] ss:$16 sps:$4 sm:$0xff]  }
 0x17d   :  { %2195 = vmatpush1.bf16.msra.mxu0 %v3638_v39  ;;  %2359 = vmatpush1.bf16.msra.mxu1 %v3641_v40  ;;  %v3706_v39 = vld [vmem:[#allocation5 + $0x604] ss:$16 sps:$4 sm:$0xff]   ;;  %v3709_v40 = vld [vmem:[#allocation5 + $0x60c] ss:$16 sps:$4 sm:$0xff]  }
 0x17e   :  { %2196 = vmatprep.subr.bf16.mxu0 %v3646_v41  ;;  %2360 = vmatprep.subr.bf16.mxu1 %v3649_v42  ;;  %v557_v41 = vadd.bf16 %v549_v35, %v443_v34  ;;  %v562_v42 = vmax.bf16 %v3943_v0, %v554_v37  ;;  %v3773_v34 = vld [vmem:[#allocation5 + $0x768] ss:$16 sps:$4 sm:$0xff]   ;;  %v3778_v37 = vld [vmem:[#allocation5 + $0x784] ss:$16 sps:$4 sm:$0xff]  }
 0x181   :  { %2197 = vmatpush1.bf16.msra.mxu0 %v3644_v43  ;;  %2361 = vmatpush1.bf16.msra.mxu1 %v3647_v44  ;;  %v3704_v43 = vld [vmem:[#allocation5 + $0x600] ss:$16 sps:$4 sm:$0xff]   ;;  %v3707_v44 = vld [vmem:[#allocation5 + $0x608] ss:$16 sps:$4 sm:$0xff]  }
 0x182   :  { %2198 = vmatprep.subr.bf16.mxu0 %v3652_v45  ;;  %2362 = vmatprep.subr.bf16.mxu1 %v3655_v46  ;;  %v3715_v45 = vld [vmem:[#allocation5 + $0x62c] ss:$16 sps:$4 sm:$0xff]   ;;  %v565_v46 = vmax.bf16 %v3943_v0, %v557_v41  ;;  %v3784_v41 = vld [vmem:[#allocation5 + $0x7a4] ss:$16 sps:$4 sm:$0xff]  }
 0x185   :  { %2199 = vmatpush1.bf16.msra.mxu0 %v3650_v47  ;;  %2363 = vmatpush1.bf16.msra.mxu1 %v3653_v48  ;;  %v3710_v47 = vld [vmem:[#allocation5 + $0x620] ss:$16 sps:$4 sm:$0xff]   ;;  %v3713_v48 = vld [vmem:[#allocation5 + $0x628] ss:$16 sps:$4 sm:$0xff]  }
 0x186   :  { %2200 = vmatprep.subr.bf16.mxu0 %v3658_v50  ;;  %2364 = vmatprep.subr.bf16.mxu1 %v3661_v51  ;;  %v3718_v50 = vld [vmem:[#allocation5 + $0x644] ss:$16 sps:$4 sm:$0xff]   ;;  %v3721_v51 = vld [vmem:[#allocation5 + $0x64c] ss:$16 sps:$4 sm:$0xff]  }
 0x189   :  { %2201 = vmatpush1.bf16.msra.mxu0 %v3656_v52  ;;  %2365 = vmatpush1.bf16.msra.mxu1 %v3659_v53  ;;  %v3716_v52 = vld [vmem:[#allocation5 + $0x640] ss:$16 sps:$4 sm:$0xff]   ;;  %v3719_v53 = vld [vmem:[#allocation5 + $0x648] ss:$16 sps:$4 sm:$0xff]  }
 0x18a   :  { %2202 = vmatprep.subr.bf16.mxu0 %v3664_v54  ;;  %2366 = vmatprep.subr.bf16.mxu1 %v3667_v55  ;;  %v3724_v54 = vld [vmem:[#allocation5 + $0x664] ss:$16 sps:$4 sm:$0xff]   ;;  %v3727_v55 = vld [vmem:[#allocation5 + $0x66c] ss:$16 sps:$4 sm:$0xff]  }
 0x18d   :  { %2203 = vmatpush1.bf16.msra.mxu0 %v3662_v56  ;;  %2367 = vmatpush1.bf16.msra.mxu1 %v3665_v57  ;;  %v3722_v56 = vld [vmem:[#allocation5 + $0x660] ss:$16 sps:$4 sm:$0xff]   ;;  %v3725_v57 = vld [vmem:[#allocation5 + $0x668] ss:$16 sps:$4 sm:$0xff]  }
 0x18e   :  { %2204 = vmatprep.subr.bf16.mxu0 %v3670_v58  ;;  %2368 = vmatprep.subr.bf16.mxu1 %v3673_v59  ;;  %v3730_v58 = vld [vmem:[#allocation5 + $0x684] ss:$16 sps:$4 sm:$0xff]   ;;  %v3733_v59 = vld [vmem:[#allocation5 + $0x68c] ss:$16 sps:$4 sm:$0xff]  }
 0x191   :  { %2205 = vmatpush1.bf16.msra.mxu0 %v3668_v61  ;;  %2369 = vmatpush1.bf16.msra.mxu1 %v3671_v62  ;;  %v3731_v61 = vld [vmem:[#allocation5 + $0x688] ss:$16 sps:$4 sm:$0xff]   ;;  %v3736_v62 = vld [vmem:[#allocation5 + $0x6a4] ss:$16 sps:$4 sm:$0xff]  }
 0x192   :  { %2206 = vmatprep.subr.bf16.mxu0 %v3676_v63  ;;  %2370 = vmatprep.subr.bf16.mxu1 %v3679_v1  ;;  %v3739_v63 = vld [vmem:[#allocation5 + $0x6ac] ss:$16 sps:$4 sm:$0xff]   ;;  %v3734_v1 = vld [vmem:[#allocation5 + $0x6a0] ss:$16 sps:$4 sm:$0xff]  }
 0x195   :  { %2207 = vmatpush1.bf16.msra.mxu0 %v3674_v4  ;;  %2371 = vmatpush1.bf16.msra.mxu1 %v3677_v49  ;;  %v3745_v4 = vld [vmem:[#allocation5 + $0x6cc] ss:$16 sps:$4 sm:$0xff]   ;;  %v3740_v49 = vld [vmem:[#allocation5 + $0x6c0] ss:$16 sps:$4 sm:$0xff]  }
 0x196   :  { %2208 = vmatprep.subr.bf16.mxu0 %v3682_v5  ;;  %2372 = vmatprep.subr.bf16.mxu1 %v3685_v6  ;;  %v3743_v5 = vld [vmem:[#allocation5 + $0x6c8] ss:$16 sps:$4 sm:$0xff]   ;;  %v3748_v6 = vld [vmem:[#allocation5 + $0x6e4] ss:$16 sps:$4 sm:$0xff]  }
 0x199   :  { %2209 = vmatpush1.bf16.msra.mxu0 %v3680_v13  ;;  %2373 = vmatpush1.bf16.msra.mxu1 %v3683_v16  ;;  %v3749_v13 = vld [vmem:[#allocation5 + $0x6e8] ss:$16 sps:$4 sm:$0xff]   ;;  %v3754_v16 = vld [vmem:[#allocation5 + $0x704] ss:$16 sps:$4 sm:$0xff]  }
 0x19a   :  { %2210 = vmatprep.subr.bf16.mxu0 %v3688_v36  ;;  %2374 = vmatprep.subr.bf16.mxu1 %v3691_v17  ;;  %v3757_v36 = vld [vmem:[#allocation5 + $0x70c] ss:$16 sps:$4 sm:$0xff]   ;;  %v3752_v17 = vld [vmem:[#allocation5 + $0x700] ss:$16 sps:$4 sm:$0xff]  }
 0x19d   :  { %2211 = vmatpush1.bf16.msra.mxu0 %v3686_v21  ;;  %2375 = vmatpush1.bf16.msra.mxu1 %v3689_v22  ;;  %v3763_v21 = vld [vmem:[#allocation5 + $0x72c] ss:$16 sps:$4 sm:$0xff]   ;;  %v3758_v22 = vld [vmem:[#allocation5 + $0x720] ss:$16 sps:$4 sm:$0xff]  }
 0x19e   :  { %2212 = vmatprep.subr.bf16.mxu0 %v3694_v23  ;;  %2376 = vmatprep.subr.bf16.mxu1 %v3697_v24  ;;  %v3761_v23 = vld [vmem:[#allocation5 + $0x728] ss:$16 sps:$4 sm:$0xff]   ;;  %v3766_v24 = vld [vmem:[#allocation5 + $0x744] ss:$16 sps:$4 sm:$0xff]  }
 0x1a1   :  { %2213 = vmatpush1.bf16.msra.mxu0 %v3692_v28  ;;  %2377 = vmatpush1.bf16.msra.mxu1 %v3695_v29  ;;  %v472_v28 = vsub.s32 6, %v4050_v7  ;;  %v3772_v29 = vld [vmem:[#allocation5 + $0x764] ss:$16 sps:$4 sm:$0xff]  }
 0x1a2   :  { %2214 = vmatprep.subr.bf16.mxu0 %v3700_v30  ;;  %2378 = vmatprep.subr.bf16.mxu1 %v3703_v33  ;;  %v3775_v30 = vld [vmem:[#allocation5 + $0x76c] ss:$16 sps:$4 sm:$0xff]   ;;  %v3770_v33 = vld [vmem:[#allocation5 + $0x760] ss:$16 sps:$4 sm:$0xff]  }
 0x1a3   :  { %v473_v35 = vrot.slane %v4058_v9, %v472_v28  ;;  %v3790_v9 = vld [vmem:[#allocation5 + $0x7c4] ss:$16 sps:$4 sm:$0xff]   ;;  %v3830_v28 = vld [vmem:[#allocation7 + $0x38] sm:$0xff]  }
 0x1a5   :  { %2215 = vmatpush1.bf16.msra.mxu0 %v3698_v38  ;;  %2379 = vmatpush1.bf16.msra.mxu1 %v3701_v32  ;;  %v3781_v38 = vld [vmem:[#allocation5 + $0x78c] ss:$16 sps:$4 sm:$0xff]   ;;  %v3776_v32 = vld [vmem:[#allocation5 + $0x780] ss:$16 sps:$4 sm:$0xff]  }
 0x1a6   :  { %2225 = vmatprep.subr.bf16.mxu0 %v3706_v39  ;;  %2389 = vmatprep.subr.bf16.mxu1 %v3709_v40  ;;  %v3779_v39 = vld [vmem:[#allocation5 + $0x788] ss:$16 sps:$4 sm:$0xff]   ;;  %v492_v40 = vpack.c.bf16 %v473_v35, %v473_v35 }
 0x1a8   :  { %2217 = vmatmul.mubr.bf16.vlgmr.msra.gmra.mrb[4].mxu0 %v562_v42  ;;  %2381 = vmatmul.mubr.bf16.vlgmr.msra.gmra.mrb[12].mxu1 %v562_v42  ;;  %v3787_v42 = vld [vmem:[#allocation5 + $0x7ac] ss:$16 sps:$4 sm:$0xff]  }
 0x1a9   :  { %2226 = vmatpush1.bf16.msra.mxu0 %v3704_v43  ;;  %2390 = vmatpush1.bf16.msra.mxu1 %v3707_v44  ;;  %v3782_v43 = vld [vmem:[#allocation5 + $0x7a0] ss:$16 sps:$4 sm:$0xff]   ;;  %v3785_v44 = vld [vmem:[#allocation5 + $0x7a8] ss:$16 sps:$4 sm:$0xff]  }
 0x1aa   :  { %2227 = vmatprep.subr.bf16.mxu0 %v3712_v15  ;;  %2391 = vmatprep.subr.bf16.mxu1 %v3715_v45  ;;  %v537_v15 = vpack.i.b16 %v492_v40, %v492_v40  ;;  %v3793_v45 = vld [vmem:[#allocation5 + $0x7cc] ss:$16 sps:$4 sm:$0xff]  }
 0x1ab   :  { %2257 = vmatprep.mubr.bf16.mxu0 %v565_v46  ;;  %2421 = vmatprep.mubr.bf16.mxu1 %v565_v46  ;;  %v3788_v46 = vld [vmem:[#allocation5 + $0x7c0] ss:$16 sps:$4 sm:$0xff]  }
 0x1ad   :  { %2228 = vmatpush1.bf16.msra.mxu0 %v3710_v47  ;;  %2392 = vmatpush1.bf16.msra.mxu1 %v3713_v48  ;;  %v3791_v47 = vld [vmem:[#allocation5 + $0x7c8] ss:$16 sps:$4 sm:$0xff]   ;;  %v442_v48 = vpack.c.bf16 %v4082_v14, %v4082_v14 }
 0x1ae   :  { %2229 = vmatprep.subr.bf16.mxu0 %v3718_v50  ;;  %2393 = vmatprep.subr.bf16.mxu1 %v3721_v51  ;;  %v542_v50 = vrot.slane %v537_v15, %v4053_v8  ;;  %v3796_v51 = vld [vmem:[#allocation5 + $0x7e4] ss:$16 sps:$4 sm:$0xff]  }
 0x1b1   :  { %2230 = vmatpush1.bf16.msra.mxu0 %v3716_v52  ;;  %2394 = vmatpush1.bf16.msra.mxu1 %v3719_v53  ;;  %v3799_v52 = vld [vmem:[#allocation5 + $0x7ec] ss:$16 sps:$4 sm:$0xff]   ;;  %v3794_v53 = vld [vmem:[#allocation5 + $0x7e0] ss:$16 sps:$4 sm:$0xff]  }
 0x1b2   :  { %2231 = vmatprep.subr.bf16.mxu0 %v3724_v54  ;;  %2395 = vmatprep.subr.bf16.mxu1 %v3727_v55  ;;  %v3797_v54 = vld [vmem:[#allocation5 + $0x7e8] ss:$16 sps:$4 sm:$0xff]   ;;  %v556_v55 = vadd.bf16 %v542_v50, %v442_v48 }
 0x1b4   :  { %v564_v14 = vmax.bf16 %v3943_v0, %v556_v55 }
 0x1b5   :  { %2232 = vmatpush1.bf16.msra.mxu0 %v3722_v56  ;;  %2396 = vmatpush1.bf16.msra.mxu1 %v3725_v57  ;;  %v3800_v56 = vld [vmem:[#allocation7 + $0x40] sm:$0xff]  }
 0x1b6   :  { %2233 = vmatprep.subr.bf16.mxu0 %v3730_v58  ;;  %2397 = vmatprep.subr.bf16.mxu1 %v3733_v59  ;;  %v3801_v57 = vld [vmem:[#allocation7 + $0xc0] sm:$0xff]  }
 0x1b7   :  { %v3802_v58 = vld [vmem:[#allocation7] sm:$0xff]  }
 0x1b8   :  { %v3803_v59 = vld [vmem:[#allocation7 + $0x80] sm:$0xff]  }
 0x1b9   :  { %2234 = vmatpush1.bf16.msra.mxu0 %v3728_v60  ;;  %2398 = vmatpush1.bf16.msra.mxu1 %v3731_v61  ;;  %v3804_v60 = vld [vmem:[#allocation7 + $0x48] sm:$0xff]  }
 0x1ba   :  { %2235 = vmatprep.subr.bf16.mxu0 %v3736_v62  ;;  %2399 = vmatprep.subr.bf16.mxu1 %v3739_v63  ;;  %v3805_v61 = vld [vmem:[#allocation7 + $0xc8] sm:$0xff]  }
 0x1bb   :  { %v3806_v62 = vld [vmem:[#allocation7 + $0x8] sm:$0xff]  }
 0x1bc   :  { %v3807_v63 = vld [vmem:[#allocation7 + $0x88] sm:$0xff]  }
 0x1bd   :  { %2236 = vmatpush1.bf16.msra.mxu0 %v3734_v1  ;;  %2400 = vmatpush1.bf16.msra.mxu1 %v3737_v2  ;;  %v3808_v1 = vld [vmem:[#allocation7 + $0x50] sm:$0xff]  }
 0x1be   :  { %2237 = vmatprep.subr.bf16.mxu0 %v3742_v3  ;;  %2401 = vmatprep.subr.bf16.mxu1 %v3745_v4  ;;  %v3809_v2 = vld [vmem:[#allocation7 + $0xd0] sm:$0xff]  }
 0x1bf   :  { %v3810_v3 = vld [vmem:[#allocation7 + $0x10] sm:$0xff]  }
 0x1c0   :  { %v3811_v4 = vld [vmem:[#allocation7 + $0x90] sm:$0xff]  }
 0x1c1   :  { %2238 = vmatpush1.bf16.msra.mxu0 %v3740_v49  ;;  %2402 = vmatpush1.bf16.msra.mxu1 %v3743_v5  ;;  %v3812_v49 = vld [vmem:[#allocation7 + $0x58] sm:$0xff]  }
 0x1c2   :  { %2239 = vmatprep.subr.bf16.mxu0 %v3748_v6  ;;  %2403 = vmatprep.subr.bf16.mxu1 %v3751_v11  ;;  %v3813_v5 = vld [vmem:[#allocation7 + $0xd8] sm:$0xff]  }
 0x1c3   :  { %v3814_v6 = vld [vmem:[#allocation7 + $0x18] sm:$0xff]  }
 0x1c4   :  { %v3815_v11 = vld [vmem:[#allocation7 + $0x98] sm:$0xff]  }
 0x1c5   :  { %2240 = vmatpush1.bf16.msra.mxu0 %v3746_v12  ;;  %2404 = vmatpush1.bf16.msra.mxu1 %v3749_v13  ;;  %v3816_v12 = vld [vmem:[#allocation7 + $0x60] sm:$0xff]  }
 0x1c6   :  { %2241 = vmatprep.subr.bf16.mxu0 %v3754_v16  ;;  %2405 = vmatprep.subr.bf16.mxu1 %v3757_v36  ;;  %v3817_v13 = vld [vmem:[#allocation7 + $0xe0] sm:$0xff]  }
 0x1c7   :  { %v3818_v16 = vld [vmem:[#allocation7 + $0x20] sm:$0xff]  }
 0x1c8   :  { %v3819_v36 = vld [vmem:[#allocation7 + $0xa0] sm:$0xff]  }
 0x1c9   :  { %2242 = vmatpush1.bf16.msra.mxu0 %v3752_v17  ;;  %2406 = vmatpush1.bf16.msra.mxu1 %v3755_v18  ;;  %v3820_v17 = vld [vmem:[#allocation7 + $0x68] sm:$0xff]  }
 0x1ca   :  { %2243 = vmatprep.subr.bf16.mxu0 %v3760_v19  ;;  %2407 = vmatprep.subr.bf16.mxu1 %v3763_v21  ;;  %v3821_v18 = vld [vmem:[#allocation7 + $0xe8] sm:$0xff]  }
 0x1cb   :  { %v3822_v19 = vld [vmem:[#allocation7 + $0x28] sm:$0xff]  }
 0x1cc   :  { %v3823_v21 = vld [vmem:[#allocation7 + $0xa8] sm:$0xff]  }
 0x1cd   :  { %2244 = vmatpush1.bf16.msra.mxu0 %v3758_v22  ;;  %2408 = vmatpush1.bf16.msra.mxu1 %v3761_v23  ;;  %v3824_v22 = vld [vmem:[#allocation7 + $0x70] sm:$0xff]  }
 0x1ce   :  { %2245 = vmatprep.subr.bf16.mxu0 %v3766_v24  ;;  %2409 = vmatprep.subr.bf16.mxu1 %v3769_v25  ;;  %v3825_v23 = vld [vmem:[#allocation7 + $0xf0] sm:$0xff]  }
 0x1cf   :  { %v3826_v24 = vld [vmem:[#allocation7 + $0x30] sm:$0xff]  }
 0x1d0   :  { %v3827_v25 = vld [vmem:[#allocation7 + $0xb0] sm:$0xff]  }
 0x1d1   :  { %2246 = vmatpush1.bf16.msra.mxu0 %v3764_v26  ;;  %2410 = vmatpush1.bf16.msra.mxu1 %v3767_v27  ;;  %v3828_v26 = vld [vmem:[#allocation7 + $0x78] sm:$0xff]  }
 0x1d2   :  { %2247 = vmatprep.subr.bf16.mxu0 %v3772_v29  ;;  %2411 = vmatprep.subr.bf16.mxu1 %v3775_v30  ;;  %v3829_v27 = vld [vmem:[#allocation7 + $0xf8] sm:$0xff]   ;;  %v3944_v30 = vmov 0.0  }
 0x1d3   :  { %v3831_v29 = vld [vmem:[#allocation7 + $0xb8] sm:$0xff]  }
 0x1d5   :  { %2248 = vmatpush1.bf16.msra.mxu0 %v3770_v33  ;;  %2412 = vmatpush1.bf16.msra.mxu1 %v3773_v34  ;;  %v2434_v33 = vld [vmem:[%s4193_s4] sm:$0xf] }
 0x1d6   :  { %2249 = vmatprep.subr.bf16.mxu0 %v3778_v37  ;;  %2413 = vmatprep.subr.bf16.mxu1 %v3781_v38  ;;  %v2439_v34 = vrot.slane %v2434_v33, %v4053_v8  ;;  %v2447_v35 = vrot.slane %v2434_v33, %v456_v31  ;;  %v2443_v37 = vrot.slane %v2434_v33, %v452_v10 }
 0x1d7   :  { %v2451_v38 = vrot.slane %v2434_v33, %v460_v20 }
 0x1d8   :  { %v2457_v40 = vpack.c.bf16 %v2443_v37, %v2443_v37 }
 0x1d9   :  { %2250 = vmatpush1.bf16.msra.mxu0 %v3776_v32  ;;  %2414 = vmatpush1.bf16.msra.mxu1 %v3779_v39  ;;  %v2456_v32 = vpack.c.bf16 %v2439_v34, %v2439_v34  ;;  %v2458_v39 = vpack.c.bf16 %v2447_v35, %v2447_v35  ;;  %v3297_v34 = vld [vmem:[%s4197_s8] ss:$0 sm:$0xff] }
 0x1da   :  { %2251 = vmatprep.subr.bf16.mxu0 %v3784_v41  ;;  %2415 = vmatprep.subr.bf16.mxu1 %v3787_v42  ;;  %v2459_v41 = vpack.c.bf16 %v2451_v38, %v2451_v38 }
 0x1db   :  { %v2461_v42 = vpack.i.b16 %v2456_v32, %v2456_v32 }
 0x1dc   :  { %v2482_v15 = vpack.i.b16 %v2459_v41, %v2459_v41 }
 0x1dd   :  { %2252 = vmatpush1.bf16.msra.mxu0 %v3782_v43  ;;  %2416 = vmatpush1.bf16.msra.mxu1 %v3785_v44  ;;  %v2475_v43 = vpack.i.b16 %v2458_v39, %v2458_v39  ;;  %v2468_v44 = vpack.i.b16 %v2457_v40, %v2457_v40 }
 0x1de   :  { %2253 = vmatprep.subr.bf16.mxu0 %v3790_v9  ;;  %2417 = vmatprep.subr.bf16.mxu1 %v3793_v45  ;;  %v2466_v9 = vrot.slane %v2461_v42, %v4053_v8  ;;  %v2487_v10 = vrot.slane %v2482_v15, %v4053_v8 }
 0x1df   :  { %v2480_v45 = vrot.slane %v2475_v43, %v4053_v8 }
 0x1e1   :  { %2254 = vmatpush1.bf16.msra.mxu0 %v3788_v46  ;;  %2418 = vmatpush1.bf16.msra.mxu1 %v3791_v47  ;;  %v2473_v47 = vrot.slane %v2468_v44, %v4053_v8 }
 0x1e2   :  { %2255 = vmatprep.subr.bf16.mxu0 %v3796_v51  ;;  %2419 = vmatprep.subr.bf16.mxu1 %v3799_v52 }
 0x1e5   :  { %2256 = vmatpush1.bf16.msra.mxu0 %v3794_v53  ;;  %2420 = vmatpush1.bf16.msra.mxu1 %v3797_v54 }
 0x1e6   :  { %3306 = vmatprep.subr.bf16.mxu0 %v3800_v56  ;;  %3328 = vmatprep.subr.bf16.mxu1 %v3801_v57 }
 0x1e8   :  { %2258 = vmatmul.mubr.bf16.vlgmr.msra.gmra.mrb[4].mxu0 %v564_v14  ;;  %2422 = vmatmul.mubr.bf16.vlgmr.msra.gmra.mrb[12].mxu1 %v564_v14 }
 0x1e9   :  { %3307 = vmatpush3.bf16.msra.mxu0 %v3802_v58  ;;  %3329 = vmatpush3.bf16.msra.mxu1 %v3803_v59 }
 0x1ea   :  { %3308 = vmatprep.subr.bf16.mxu0 %v3804_v60  ;;  %3330 = vmatprep.subr.bf16.mxu1 %v3805_v61 }
 0x1ed   :  { %3309 = vmatpush3.bf16.msra.mxu0 %v3806_v62  ;;  %3331 = vmatpush3.bf16.msra.mxu1 %v3807_v63  ;;  %v3832_v62 = vld [vmem:[%s4196_s7] sm:$0xff]  }
 0x1ee   :  { %3310 = vmatprep.subr.bf16.mxu0 %v3808_v1  ;;  %3332 = vmatprep.subr.bf16.mxu1 %v3809_v2  ;;  %v3833_v2 = vld [vmem:[%s4196_s7 + $0x8] sm:$0xff]  }
 0x1f1   :  { %3311 = vmatpush3.bf16.msra.mxu0 %v3810_v3  ;;  %3333 = vmatpush3.bf16.msra.mxu1 %v3811_v4  ;;  %v3834_v3 = vld [vmem:[%s4196_s7 + $0x10] sm:$0xff]   ;;  %v3835_v4 = vld [vmem:[%s4196_s7 + $0x18] sm:$0xff]  }
 0x1f2   :  { %3312 = vmatprep.subr.bf16.mxu0 %v3812_v49  ;;  %3334 = vmatprep.subr.bf16.mxu1 %v3813_v5  ;;  %v3836_v49 = vld [vmem:[%s4196_s7 + $0x20] sm:$0xff]   ;;  %v3837_v5 = vld [vmem:[%s4196_s7 + $0x28] sm:$0xff]  }
 0x1f5   :  { %3313 = vmatpush3.bf16.msra.mxu0 %v3814_v6  ;;  %3335 = vmatpush3.bf16.msra.mxu1 %v3815_v11  ;;  %v3838_v6 = vld [vmem:[%s4196_s7 + $0x30] sm:$0xff]   ;;  %v3839_v11 = vld [vmem:[%s4196_s7 + $0x38] sm:$0xff]  }
 0x1f6   :  { %3314 = vmatprep.subr.bf16.mxu0 %v3816_v12  ;;  %3336 = vmatprep.subr.bf16.mxu1 %v3817_v13  ;;  %v2833_v12 = vld [vmem:[%s4195_s6] sm:$0x1] }
 0x1f7   :  { %v2834_v13 = vpack.c.bf16 %v2833_v12, %v2833_v12 }
 0x1f9   :  { %3315 = vmatpush3.bf16.msra.mxu0 %v3818_v16  ;;  %3337 = vmatpush3.bf16.msra.mxu1 %v3819_v36 }
 0x1fa   :  { %3316 = vmatprep.subr.bf16.mxu0 %v3820_v17  ;;  %3338 = vmatprep.subr.bf16.mxu1 %v3821_v18  ;;  %v2836_v17 = vpack.i.b16 %v2834_v13, %v2834_v13 }
 0x1fd   :  { %3317 = vmatpush3.bf16.msra.mxu0 %v3822_v19  ;;  %3339 = vmatpush3.bf16.msra.mxu1 %v3823_v21 }
 0x1fe   :  { %3318 = vmatprep.subr.bf16.mxu0 %v3824_v22  ;;  %3340 = vmatprep.subr.bf16.mxu1 %v3825_v23 }
 0x201   :  { %3319 = vmatpush3.bf16.msra.mxu0 %v3826_v24  ;;  %3341 = vmatpush3.bf16.msra.mxu1 %v3827_v25 }
 0x202   :  { %3320 = vmatprep.subr.bf16.mxu0 %v3828_v26  ;;  %3342 = vmatprep.subr.bf16.mxu1 %v3829_v27 }
 0x205   :  { %3321 = vmatpush3.bf16.msra.mxu0 %v3830_v28  ;;  %3343 = vmatpush3.bf16.msra.mxu1 %v3831_v29  ;;  %v2841_v28 = vrot.slane %v2836_v17, %v4053_v8 }
 0x206   :  { %3359 = vmatprep.subr.bf16.mxu0 %v3944_v30 }
 0x2bb   :  { %v2259_v46 = vpop.f32.mrb[4].mxu0  ;;  %v2423_v31 = vpop.f32.mrb[12].mxu1 }
 0x2bc   :  { %v2430_v7 = vpack.c.bf16 %v2259_v46, %v2259_v46  ;;  %v2432_v20 = vpack.c.bf16 %v2423_v31, %v2423_v31  ;;  %v2261_v48 = vpop.f32.mrb[5].mxu0  ;;  %v2425_v50 = vpop.f32.mrb[13].mxu1 }
 0x2bd   :  { %v2431_v51 = vpack.c.bf16 %v2261_v48, %v2261_v48  ;;  %v2433_v52 = vpack.c.bf16 %v2425_v50, %v2425_v50  ;;  %v2263_v53 = vpop.f32.mrb[6].mxu0  ;;  %v2427_v54 = vpop.f32.mrb[14].mxu1 }
 0x2be   :  { %v2488_v55 = vadd.bf16 %v2466_v9, %v2430_v7  ;;  %v2490_v56 = vadd.bf16 %v2480_v45, %v2432_v20  ;;  %v2264_v57 = vpop.f32.mrb[7].mxu0  ;;  %v2428_v58 = vpop.f32.mrb[15].mxu1 }
 0x2bf   :  { %v2489_v59 = vadd.bf16 %v2473_v47, %v2431_v51  ;;  %v2491_v14 = vadd.bf16 %v2487_v10, %v2433_v52 }
 0x2c0   :  { %v2492_v63 = vmax.bf16 %v3943_v0, %v2488_v55  ;;  %v2494_v1 = vmax.bf16 %v3943_v0, %v2490_v56 }
 0x2c1   :  { %v2493_v60 = vmax.bf16 %v3943_v0, %v2489_v59  ;;  %v2495_v61 = vmax.bf16 %v3943_v0, %v2491_v14 }
 0x2c3   :  { %2784 = vmatprep.mubr.bf16.mxu0 %v2493_v60  ;;  %2824 = vmatprep.mubr.bf16.mxu1 %v2495_v61 }
 0x2c4   :  { %2785 = vmatmul.mubr.bf16.vlgmr.msra.gmra.mrb[8].mxu0 %v2492_v63  ;;  %2825 = vmatmul.mubr.bf16.vlgmr.msra.gmra.mrb[16].mxu1 %v2494_v1 }
 0x2c5   :  { %3360 = vmatpush3.bf16.msra.mxu0 %v3832_v62  ;;  %3375 = vmatprep.mubr.msk.bf16.mxu0 %vm3945_vm1, %v3944_v30 }
 0x2c6   :  { %3361 = vmatprep.subr.bf16.mxu0 %v3944_v30 }
 0x2c9   :  { %3362 = vmatpush3.bf16.msra.mxu0 %v3833_v2 }
 0x2ca   :  { %3363 = vmatprep.subr.bf16.mxu0 %v3944_v30 }
 0x2cd   :  { %3364 = vmatpush3.bf16.msra.mxu0 %v3834_v3 }
 0x2ce   :  { %3365 = vmatprep.subr.bf16.mxu0 %v3944_v30 }
 0x2d1   :  { %3366 = vmatpush3.bf16.msra.mxu0 %v3835_v4 }
 0x2d2   :  { %3367 = vmatprep.subr.bf16.mxu0 %v3944_v30 }
 0x2d5   :  { %3368 = vmatpush3.bf16.msra.mxu0 %v3836_v49 }
 0x2d6   :  { %3369 = vmatprep.subr.bf16.mxu0 %v3944_v30 }
 0x2d9   :  { %3370 = vmatpush3.bf16.msra.mxu0 %v3837_v5 }
 0x2da   :  { %3371 = vmatprep.subr.bf16.mxu0 %v3944_v30 }
 0x2dd   :  { %3372 = vmatpush3.bf16.msra.mxu0 %v3838_v6 }
 0x2de   :  { %3373 = vmatprep.subr.bf16.mxu0 %v3944_v30 }
 0x2e1   :  { %3374 = vmatpush3.bf16.msra.mxu0 %v3839_v11 }
 0x397   :  { %v3322_v16 = vpop.f32.mrb[8].mxu0  ;;  %v3344_v36 = vpop.f32.mrb[16].mxu1 }
 0x398   :  { %v3323_v18 = vpop.f32.mrb[9].mxu0  ;;  %v3345_v19 = vpop.f32.mrb[17].mxu1 }
 0x399   :  { %v3324_v21 = vadd.f32 %v3323_v18, %v3322_v16  ;;  %v3346_v22 = vadd.f32 %v3345_v19, %v3344_v36  ;;  %v3325_v23 = vpop.f32.mrb[10].mxu0  ;;  %v3347_v24 = vpop.f32.mrb[18].mxu1 }
 0x39a   :  { %v3326_v25 = vpop.f32.mrb[11].mxu0  ;;  %v3348_v26 = vpop.f32.mrb[19].mxu1 }
 0x39b   :  { %v2827_v27 = vadd.f32 %v3346_v22, %v3324_v21 }
 0x39d   :  { %v2832_v29 = vpack.c.bf16 %v2827_v27, %v2827_v27 }
 0x39f   :  { %v2842_v30 = vadd.bf16 %v2841_v28, %v2832_v29 }
 0x3a1   :  { %v2843_v33 = vmax.bf16 %v3943_v0, %v2842_v30 }
 0x3a3   :  { %3376 = vmatmul.mubr.bf16.vlgmr.msra.gmra.mrb[12].mxu0 %v2843_v33 }
 0x476   :  { %v2949_v35 = vpop.f32.mrb[12].mxu0 }
 0x477   :  { %v2950_v37 = vadd.f32 %v3297_v34, %v2949_v35  ;;  %v3377_v38 = vpop.f32.mrb[13].mxu0 }
 0x478   :  { %v2952_v32 = vpop.f32.mrb[14].mxu0 }
 0x479   :  { %v3378_v39 = vpop.f32.mrb[15].mxu0  ;;  %2956 = vst.msk [vmem:[#allocation8] sm:$0xff] %vm2955_vm2, %v2950_v37 }
 0x47a   :  { %3917 = shalt.err (!%p3914_p0)
}
 0x47b   :  { %s3918_s8 = scalar_lea.hbm %s4198_s9, 128 }
 0x47c   :  { %p3919_p1 = scmp.ne.s32.totalorder %s4198_s9, %s3918_s8  ;;  %p3922_p2 = scmp.lt.u32.totalorder %s3918_s8, %s4198_s9 }
 0x47e   :  { %p3924_p3 = pnand %p3922_p2, %p3919_p1 }
 0x480   :  { %3927 = shalt.err (!%p3924_p3)
}
 0x481   :  { %2966 = dma.vmem_to_hbm [thread:$0]  %s2964_s26, 128, %s4198_s9, [#allocation4]  }
 0x482   :  { %3932 = dma.done.wait [#allocation4], 128  }
 0x483   :  { %3933 = vsyncadd [#allocation4], 4294967168 }
 0x484   :  { %2970 = vsyncpa [#allocation3], 1 }
 0x485   :  { %2971 = vsyncpa [#allocation6], 1 }
 0x486   :  { %2972 = vsyncpa [#allocation4], 1 }

</bundles_post_ra>
